<compile_context>
chip_gen: v5e
topology: v5e:2x2
jax: 0.10.0
libtpu: 0.0.40
codegen_flags: <defaults>
</compile_context>

<pallas_src>
import math
import functools

import jax
import jax.numpy as jnp
from jax.experimental import pallas as pl
from jax.experimental.pallas import tpu as pltpu


def _default_vmem_limit():
    # v7x has 64 MiB VMEM per TensorCore -> keep a conservative budget there;
    # v4/v5e/v6e have 128 MiB -> allow bigger tiles / deeper buffering.
    try:
        kind = jax.devices()[0].device_kind.lower()
    except Exception:
        return 32 * 1024 * 1024
    if "v7" in kind or "7x" in kind:
        return 48 * 1024 * 1024
    return 64 * 1024 * 1024


VMEM_LIMIT = _default_vmem_limit()

# Weight-streaming matmul tile targets (bf16 operands, f32 accumulation).
TM_TARGET = 512
TN_TARGET = 512


def _pick_tile(dim, target, align=128):
    """Largest tile <= target that evenly divides dim, preferring `align`-multiples."""
    if dim <= target:
        return dim
    t = (target // align) * align
    while t >= align:
        if dim % t == 0:
            return t
        t -= align
    t = (target // 8) * 8
    while t >= 8:
        if dim % t == 0:
            return t
        t -= 8
    # ragged dim: callers pad (e.g. vocab) upstream; full-dim block as last resort.
    return dim


def _gelu(y):
    # tanh-approx GELU (matches HF GPT-2 "gelu_new")
    return 0.5 * y * (1.0 + jnp.tanh(0.7978845608028654 * (y + 0.044715 * y * y * y)))


# ----------------------------- Pallas kernels ------------------------------

def _matmul_kernel(*refs, has_residual, activation):
    """y = x @ w + b (+ optional GELU) (+ optional residual).  bf16 in, f32 acc."""
    if has_residual:
        x_ref, w_ref, b_ref, r_ref, o_ref = refs
    else:
        x_ref, w_ref, b_ref, o_ref = refs
    y = jnp.dot(x_ref[...].astype(jnp.bfloat16), w_ref[...],
                preferred_element_type=jnp.float32)
    y = y + b_ref[...]
    if activation == "gelu":
        y = _gelu(y)
    if has_residual:
        y = y + r_ref[...].astype(jnp.float32)
    o_ref[...] = y.astype(o_ref.dtype)


def _ln_matmul_kernel(x_ref, g_ref, b_ref, w_ref, wb_ref, o_ref, xn_ref, *, activation):
    """Fused LayerNorm(x) @ w + b (+ optional GELU).

    LayerNorm is computed once per row tile (j == 0) into a VMEM scratch and
    reused for every N tile; the x block (index map (i, 0)) stays resident
    across j, and the j grid axis is marked "arbitrary" so all j for a given i
    run sequentially on the same core.
    """
    @pl.when(pl.program_id(1) == 0)
    def _():
        x = x_ref[...].astype(jnp.float32)
        mu = jnp.mean(x, axis=-1, keepdims=True)
        xc = x - mu
        var = jnp.mean(xc * xc, axis=-1, keepdims=True)
        xn = xc * jax.lax.rsqrt(var + 1e-5) * g_ref[...] + b_ref[...]
        xn_ref[...] = xn.astype(jnp.bfloat16)

    y = jnp.dot(xn_ref[...], w_ref[...], preferred_element_type=jnp.float32)
    y = y + wb_ref[...]
    if activation == "gelu":
        y = _gelu(y)
    o_ref[...] = y.astype(o_ref.dtype)


def _attn_kernel(q_ref, k_ref, v_ref, o_ref, *,
                 heads, head_dim, q_base, k_base, v_base, scale):
    """Causal self-attention for one (batch, head-group, query-tile) grid step.

    q_ref: (1, TQ, C) bf16, k_ref/v_ref: (1, S, C) bf16, o_ref: (1, TQ, Gd) bf16.
    On the aligned path C == Gd == 128 (a head pair for head_dim=64) and every
    load/store is 128-lane dense; the head/group axis lives in the grid, which
    bounds live ranges (only `heads` <= 2 per call on that path).
    """
    TQ = q_ref.shape[1]
    S = k_ref.shape[1]
    qi = pl.program_id(2)
    row = jax.lax.broadcasted_iota(jnp.int32, (TQ, S), 0) + qi * TQ
    col = jax.lax.broadcasted_iota(jnp.int32, (TQ, S), 1)
    causal = col <= row
    # TODO(synk): for very long sequences (S >~ 8K) stream K/V tiles with an
    # online softmax instead of holding the full (S, Gd) group slab in VMEM.
    outs = []
    for h in range(heads):
        q = q_ref[0, :, q_base + h * head_dim:q_base + (h + 1) * head_dim]
        k = k_ref[0, :, k_base + h * head_dim:k_base + (h + 1) * head_dim]
        v = v_ref[0, :, v_base + h * head_dim:v_base + (h + 1) * head_dim]
        s = jax.lax.dot_general(q, k, (((1,), (1,)), ((), ())),
                                preferred_element_type=jnp.float32) * scale
        s = jnp.where(causal, s, -1e30)
        m = jnp.max(s, axis=-1, keepdims=True)
        p = jnp.exp(s - m)
        p = p * pl.reciprocal(jnp.sum(p, axis=-1, keepdims=True), approx=True)
        outs.append(jnp.dot(p.astype(jnp.bfloat16), v,
                            preferred_element_type=jnp.float32))
    o = outs[0] if len(outs) == 1 else jnp.concatenate(outs, axis=-1)
    o_ref[0, :, :] = o.astype(o_ref.dtype)      # one lane-dense store per step


def _final_ln_critic_kernel(x_ref, g_ref, b_ref, hw_ref, hb_ref, hf_ref, cv_ref):
    """Final LayerNorm fused with the scalar value head (lane reduction)."""
    x = x_ref[...].astype(jnp.float32)
    mu = jnp.mean(x, axis=-1, keepdims=True)
    xc = x - mu
    var = jnp.mean(xc * xc, axis=-1, keepdims=True)
    xn = xc * jax.lax.rsqrt(var + 1e-5) * g_ref[...] + b_ref[...]
    hf_ref[...] = xn.astype(hf_ref.dtype)
    cv = jnp.sum(xn * hw_ref[...], axis=-1, keepdims=True) + hb_ref[...]
    # store 128-lane-dense (unmasked vst); wrapper slices column 0
    cv_ref[...] = jnp.broadcast_to(cv, cv_ref.shape).astype(cv_ref.dtype)


# ------------------------------ host wrappers -------------------------------

def linear(x2d, w, b, *, residual=None, activation="none", out_dtype=jnp.bfloat16):
    M, K = x2d.shape
    N = w.shape[1]
    TM = _pick_tile(M, TM_TARGET)
    TN = _pick_tile(N, TN_TARGET)
    has_res = residual is not None
    in_specs = [
        pl.BlockSpec((TM, K), lambda i, j: (i, 0)),
        pl.BlockSpec((K, TN), lambda i, j: (0, j)),
        pl.BlockSpec((1, TN), lambda i, j: (0, j)),
    ]
    args = [x2d, w, b.reshape(1, N).astype(jnp.float32)]
    if has_res:
        in_specs.append(pl.BlockSpec((TM, TN), lambda i, j: (i, j)))
        args.append(residual)
    return pl.pallas_call(
        functools.partial(_matmul_kernel, has_residual=has_res, activation=activation),
        out_shape=jax.ShapeDtypeStruct((M, N), out_dtype),
        grid=(M // TM, N // TN),
        in_specs=in_specs,
        out_specs=pl.BlockSpec((TM, TN), lambda i, j: (i, j)),
        compiler_params=pltpu.CompilerParams(
            dimension_semantics=("parallel", "parallel"),
            vmem_limit_bytes=VMEM_LIMIT),
    )(*args)


def ln_linear(x2d, g, b, w, wb, *, activation="none", out_dtype=jnp.bfloat16):
    M, K = x2d.shape
    N = w.shape[1]
    TM = _pick_tile(M, TM_TARGET)
    TN = _pick_tile(N, TN_TARGET)
    return pl.pallas_call(
        functools.partial(_ln_matmul_kernel, activation=activation),
        out_shape=jax.ShapeDtypeStruct((M, N), out_dtype),
        grid=(M // TM, N // TN),
        in_specs=[
            pl.BlockSpec((TM, K), lambda i, j: (i, 0)),
            pl.BlockSpec((1, K), lambda i, j: (0, 0)),
            pl.BlockSpec((1, K), lambda i, j: (0, 0)),
            pl.BlockSpec((K, TN), lambda i, j: (0, j)),
            pl.BlockSpec((1, TN), lambda i, j: (0, j)),
        ],
        out_specs=pl.BlockSpec((TM, TN), lambda i, j: (i, j)),
        scratch_shapes=[pltpu.VMEM((TM, K), jnp.bfloat16)],
        compiler_params=pltpu.CompilerParams(
            # j must be sequential per i so the LN scratch computed at j==0 is valid
            dimension_semantics=("parallel", "arbitrary"),
            vmem_limit_bytes=VMEM_LIMIT),
    )(x2d,
      g.reshape(1, K).astype(jnp.float32),
      b.reshape(1, K).astype(jnp.float32),
      w,
      wb.reshape(1, N).astype(jnp.float32))


def causal_attention(qkv, *, n_heads):
    """qkv: (B, S, 3H) bf16 -> (B, S, H) bf16, no host-side transposes."""
    B, S, threeH = qkv.shape
    H = threeH // 3
    Dh = H // n_heads
    scale = 1.0 / math.sqrt(Dh)
    TQ = _pick_tile(S, 256, align=8)
    grid_q = S // TQ

    if Dh % 128 == 0:
        G = 1                                   # a single head is already lane-dense
    elif (128 % Dh == 0) and (n_heads % (128 // Dh) == 0):
        G = 128 // Dh                           # e.g. head_dim=64 -> head pairs
    else:
        G = 0                                   # fallback: whole hidden per group

    if G:
        Gd = G * Dh                             # multiple of 128 by construction
        n_groups = n_heads // G
        kern = functools.partial(_attn_kernel, heads=G, head_dim=Dh,
                                 q_base=0, k_base=0, v_base=0, scale=scale)
        in_specs = [
            pl.BlockSpec((1, TQ, Gd), lambda b, g, qi: (b, qi, g)),
            pl.BlockSpec((1, S, Gd), lambda b, g, qi: (b, 0, n_groups + g)),
            pl.BlockSpec((1, S, Gd), lambda b, g, qi: (b, 0, 2 * n_groups + g)),
        ]
        out_spec = pl.BlockSpec((1, TQ, Gd), lambda b, g, qi: (b, qi, g))
    else:
        # TODO(synk): configs whose heads can't be grouped to a 128-lane multiple
        # (e.g. odd head counts) fall back to whole-hidden slabs per query tile.
        n_groups = 1
        kern = functools.partial(_attn_kernel, heads=n_heads, head_dim=Dh,
                                 q_base=0, k_base=H, v_base=2 * H, scale=scale)
        in_specs = [
            pl.BlockSpec((1, TQ, threeH), lambda b, g, qi: (b, qi, 0)),
            pl.BlockSpec((1, S, threeH), lambda b, g, qi: (b, 0, 0)),
            pl.BlockSpec((1, S, threeH), lambda b, g, qi: (b, 0, 0)),
        ]
        out_spec = pl.BlockSpec((1, TQ, H), lambda b, g, qi: (b, qi, 0))

    return pl.pallas_call(
        kern,
        out_shape=jax.ShapeDtypeStruct((B, S, H), jnp.bfloat16),
        grid=(B, n_groups, grid_q),
        in_specs=in_specs,
        out_specs=out_spec,
        compiler_params=pltpu.CompilerParams(
            dimension_semantics=("parallel", "parallel", "parallel"),
            vmem_limit_bytes=VMEM_LIMIT),
    )(qkv, qkv, qkv)


def final_layernorm_and_critic(x2d, g, b, head_w, head_b):
    M, H = x2d.shape
    TM = _pick_tile(M, TM_TARGET)
    CV_LANES = 128
    hf, cv_pad = pl.pallas_call(
        _final_ln_critic_kernel,
        out_shape=(jax.ShapeDtypeStruct((M, H), jnp.bfloat16),
                   jax.ShapeDtypeStruct((M, CV_LANES), jnp.float32)),
        grid=(M // TM,),
        in_specs=[
            pl.BlockSpec((TM, H), lambda i: (i, 0)),
            pl.BlockSpec((1, H), lambda i: (0, 0)),
            pl.BlockSpec((1, H), lambda i: (0, 0)),
            pl.BlockSpec((1, H), lambda i: (0, 0)),
            pl.BlockSpec((1, 1), lambda i: (0, 0)),
        ],
        out_specs=(pl.BlockSpec((TM, H), lambda i: (i, 0)),
                   pl.BlockSpec((TM, CV_LANES), lambda i: (i, 0))),
        compiler_params=pltpu.CompilerParams(
            dimension_semantics=("parallel",),
            vmem_limit_bytes=VMEM_LIMIT),
    )(x2d,
      g.reshape(1, H).astype(jnp.float32),
      b.reshape(1, H).astype(jnp.float32),
      head_w.reshape(1, H).astype(jnp.float32),
      head_b.reshape(1, 1).astype(jnp.float32))
    return hf, cv_pad[:, :1]


# --------------------------- model (glue + params) --------------------------

def init_params(key, vocab, max_seq, hidden, n_layers, n_heads, ff):
    vocab_pad = ((vocab + 127) // 128) * 128     # pad LM head to 128-lane multiple
    keys = jax.random.split(key, 3 + 4 * n_layers)
    ki = iter(keys)

    def w_init(k, shape):
        # bf16 storage for matmul weights/embeddings (f32 accumulation in kernels)
        return (0.02 * jax.random.normal(k, shape, jnp.float32)).astype(jnp.bfloat16)

    p = {
        "wte": w_init(next(ki), (vocab, hidden)),
        "wpe": w_init(next(ki), (max_seq, hidden)),
        "lnf_g": jnp.ones((hidden,), jnp.float32),
        "lnf_b": jnp.zeros((hidden,), jnp.float32),
        # LM head stored pre-padded to vocab_pad; padded logits are sliced off
        "lm_head_w": w_init(next(ki), (hidden, vocab_pad)),
        "lm_head_b": jnp.zeros((vocab_pad,), jnp.float32),
        # scalar_head = layer_init(nn.Linear(hidden, 1), std=0) -> zero W, zero b
        "head_w": jnp.zeros((hidden, 1), jnp.float32),
        "head_b": jnp.zeros((1,), jnp.float32),
        "blocks": [],
    }
    for _ in range(n_layers):
        blk = {
            "ln1_g": jnp.ones((hidden,), jnp.float32),
            "ln1_b": jnp.zeros((hidden,), jnp.float32),
            "attn_w": w_init(next(ki), (hidden, 3 * hidden)),
            "attn_b": jnp.zeros((3 * hidden,), jnp.float32),
            "proj_w": w_init(next(ki), (hidden, hidden)),
            "proj_b": jnp.zeros((hidden,), jnp.float32),
            "ln2_g": jnp.ones((hidden,), jnp.float32),
            "ln2_b": jnp.zeros((hidden,), jnp.float32),
            "fc_w": w_init(next(ki), (hidden, ff)),
            "fc_b": jnp.zeros((ff,), jnp.float32),
            "fc2_w": w_init(next(ki), (ff, hidden)),
            "fc2_b": jnp.zeros((hidden,), jnp.float32),
        }
        p["blocks"].append(blk)
    return p


def forward(params, tokens, *, n_heads):
    """Returns ((logits, last_hidden_states), critic_value), like the nn.Module."""
    B, S = tokens.shape
    V, H = params["wte"].shape                # true (unpadded) vocab
    M = B * S

    # TODO(synk): token/position embedding gather stays in XLA (vocab gather has
    # no clean tiled-BlockSpec expression and is cheap relative to the matmuls).
    h = (params["wte"][tokens] + params["wpe"][:S][None, :, :]).astype(jnp.bfloat16)
    h2 = h.reshape(M, H)                      # residual stream, bf16

    for blk in params["blocks"]:
        # LN1 fused into the qkv projection (LN computed once per row tile)
        qkv = ln_linear(h2, blk["ln1_g"], blk["ln1_b"], blk["attn_w"], blk["attn_b"])
        # attention over (batch, head-group, query-tile) grid; lane-dense stores
        attn = causal_attention(qkv.reshape(B, S, 3 * H), n_heads=n_heads)
        # output projection with the residual add fused in
        h2 = linear(attn.reshape(M, H), blk["proj_w"], blk["proj_b"], residual=h2)
        # LN2 + fc + GELU fused
        ffn = ln_linear(h2, blk["ln2_g"], blk["ln2_b"], blk["fc_w"], blk["fc_b"],
                        activation="gelu")
        # fc2 with the residual add fused in
        h2 = linear(ffn, blk["fc2_w"], blk["fc2_b"], residual=h2)

    # final LayerNorm fused with the zero-init scalar value head; hf kept bf16
    hf2, critic2 = final_layernorm_and_critic(
        h2, params["lnf_g"], params["lnf_b"], params["head_w"], params["head_b"])
    logits = linear(hf2, params["lm_head_w"], params["lm_head_b"],
                    out_dtype=jnp.float32)
    if logits.shape[1] != V:                  # drop the 128-pad columns
        logits = logits[:, :V]

    return (logits.reshape(B, S, V), hf2.reshape(B, S, H)), critic2.reshape(B, S, 1)


# --------------------------------- main -------------------------------------

if __name__ == "__main__":
    B, S = 2, 8
    hidden, n_heads, n_layers = 128, 2, 2      # head_dim=64 -> 128-lane head pairs
    ff, vocab, max_seq = 4 * 128, 200, 16      # vocab=200 exercises the 128-pad path

    key = jax.random.PRNGKey(0)
    pkey, tkey = jax.random.split(key)
    params = init_params(pkey, vocab, max_seq, hidden, n_layers, n_heads, ff)
    tokens = jax.random.randint(tkey, (B, S), 0, vocab, dtype=jnp.int32)

    fwd = jax.jit(functools.partial(forward, n_heads=n_heads))
    (logits, last_hidden), critic_value = fwd(params, tokens)
    jax.block_until_ready((logits, last_hidden, critic_value))

    assert logits.shape == (B, S, vocab)
    assert last_hidden.shape == (B, S, hidden)
    assert critic_value.shape == (B, S, 1)
    assert bool(jnp.all(jnp.isfinite(logits.astype(jnp.float32))))
    # scalar head is zero-init (std=0, bias=0) -> critic value must be exactly 0
    assert bool(jnp.all(critic_value == 0.0))

    print("KERNEL_OK")
</pallas_src>

<mosaic_0001>
module attributes {stable_mosaic.version = 11 : i64} {
  func.func @_matmul_kernel(%arg0: i32, %arg1: i32, %arg2: memref<16x128xbf16, #tpu.memory_space<vmem>>, %arg3: memref<128x128xbf16, #tpu.memory_space<vmem>>, %arg4: memref<1x128xf32, #tpu.memory_space<vmem>>, %arg5: memref<16x128xbf16, #tpu.memory_space<vmem>>, %arg6: memref<16x128xbf16, #tpu.memory_space<vmem>>) attributes {dimension_semantics = [#tpu.dimension_semantics<parallel>, #tpu.dimension_semantics<parallel>], iteration_bounds = array<i64: 1, 1>, scalar_prefetch = 0 : i64, scratch_operands = 0 : i64, tpu.core_type = #tpu.core_type<tc>, window_params = [{transform_indices = @transform_0, window_bounds = array<i64: 16, 128>}, {transform_indices = @transform_1, window_bounds = array<i64: 128, 128>}, {transform_indices = @transform_2, window_bounds = array<i64: 1, 128>}, {transform_indices = @transform_3, window_bounds = array<i64: 16, 128>}, {transform_indices = @transform_4, window_bounds = array<i64: 16, 128>}]} {
    %c0 = arith.constant 0 : index
    %c0_0 = arith.constant 0 : index
    %0 = vector.load %arg2[%c0, %c0_0] : memref<16x128xbf16, #tpu.memory_space<vmem>>, vector<16x128xbf16>
    %c0_1 = arith.constant 0 : index
    %c0_2 = arith.constant 0 : index
    %1 = vector.load %arg3[%c0_1, %c0_2] : memref<128x128xbf16, #tpu.memory_space<vmem>>, vector<128x128xbf16>
    %cst = arith.constant dense<0.000000e+00> : vector<16x128xf32>
    %2 = tpu.matmul %0, %1, %cst {dimension_numbers = #tpu.dot_dimension_numbers<[1], [0], [0], [1], [0, 0, 1, 1], [], []>} : vector<16x128xbf16>, vector<128x128xbf16>, vector<16x128xf32> -> vector<16x128xf32>
    %c0_3 = arith.constant 0 : index
    %c0_4 = arith.constant 0 : index
    %3 = vector.load %arg4[%c0_3, %c0_4] : memref<1x128xf32, #tpu.memory_space<vmem>>, vector<1x128xf32>
    %4 = vector.broadcast %3 : vector<1x128xf32> to vector<16x128xf32>
    %5 = arith.addf %2, %4 : vector<16x128xf32>
    %c0_5 = arith.constant 0 : index
    %c0_6 = arith.constant 0 : index
    %6 = vector.load %arg5[%c0_5, %c0_6] : memref<16x128xbf16, #tpu.memory_space<vmem>>, vector<16x128xbf16>
    %7 = arith.extf %6 : vector<16x128xbf16> to vector<16x128xf32>
    %8 = arith.addf %5, %7 : vector<16x128xf32>
    %9 = arith.truncf %8 : vector<16x128xf32> to vector<16x128xbf16>
    %c0_7 = arith.constant 0 : index
    %c0_8 = arith.constant 0 : index
    %10 = vector.load %arg6[%c0_7, %c0_8] : memref<16x128xbf16, #tpu.memory_space<vmem>>, vector<16x128xbf16>
    tpu.vector_store %arg6[%c0_7, %c0_8], %9 {strides = array<i32>} : memref<16x128xbf16, #tpu.memory_space<vmem>>, vector<16x128xbf16>,
    return
  }
  func.func @transform_0(%arg0: i32, %arg1: i32) -> (i32, i32) {
    %c0_i32 = arith.constant 0 : i32
    %c0_i32_0 = arith.constant 0 : i32
    return %arg0, %c0_i32 : i32, i32
  }
  func.func @transform_1(%arg0: i32, %arg1: i32) -> (i32, i32) {
    %c0_i32 = arith.constant 0 : i32
    %c0_i32_0 = arith.constant 0 : i32
    return %c0_i32, %arg1 : i32, i32
  }
  func.func @transform_2(%arg0: i32, %arg1: i32) -> (i32, i32) {
    %c0_i32 = arith.constant 0 : i32
    %c0_i32_0 = arith.constant 0 : i32
    return %c0_i32, %arg1 : i32, i32
  }
  func.func @transform_3(%arg0: i32, %arg1: i32) -> (i32, i32) {
    %c0_i32 = arith.constant 0 : i32
    return %arg0, %arg1 : i32, i32
  }
  func.func @transform_4(%arg0: i32, %arg1: i32) -> (i32, i32) {
    %c0_i32 = arith.constant 0 : i32
    return %arg0, %arg1 : i32, i32
  }
}

module attributes {stable_mosaic.version = 11 : i64} {
  func.func @_ln_matmul_kernel(%arg0: i32, %arg1: i32, %arg2: memref<16x128xbf16, #tpu.memory_space<vmem>>, %arg3: memref<1x128xf32, #tpu.memory_space<vmem>>, %arg4: memref<1x128xf32, #tpu.memory_space<vmem>>, %arg5: memref<128x384xbf16, #tpu.memory_space<vmem>>, %arg6: memref<1x384xf32, #tpu.memory_space<vmem>>, %arg7: memref<16x384xbf16, #tpu.memory_space<vmem>>, %arg8: memref<16x128xbf16, #tpu.memory_space<vmem>>) attributes {dimension_semantics = [#tpu.dimension_semantics<parallel>, #tpu.dimension_semantics<arbitrary>], iteration_bounds = array<i64: 1, 1>, scalar_prefetch = 0 : i64, scratch_operands = 1 : i64, tpu.core_type = #tpu.core_type<tc>, window_params = [{transform_indices = @transform_0, window_bounds = array<i64: 16, 128>}, {pipeline_mode = #tpu.pipeline_mode<synchronous>, transform_indices = @transform_1, window_bounds = array<i64: 1, 128>}, {pipeline_mode = #tpu.pipeline_mode<synchronous>, transform_indices = @transform_2, window_bounds = array<i64: 1, 128>}, {transform_indices = @transform_3, window_bounds = array<i64: 128, 384>}, {transform_indices = @transform_4, window_bounds = array<i64: 1, 384>}, {transform_indices = @transform_5, window_bounds = array<i64: 16, 384>}]} {
    %c0_i32 = arith.constant 0 : i32
    %0 = arith.cmpi eq, %arg1, %c0_i32 : i32
    %1 = arith.extui %0 : i1 to i32
    %c0_i32_0 = arith.constant 0 : i32
    %2 = arith.cmpi ne, %1, %c0_i32_0 : i32
    scf.if %2 {
      %c0_8 = arith.constant 0 : index
      %c0_9 = arith.constant 0 : index
      %11 = vector.load %arg2[%c0_8, %c0_9] : memref<16x128xbf16, #tpu.memory_space<vmem>>, vector<16x128xbf16>
      %12 = arith.extf %11 : vector<16x128xbf16> to vector<16x128xf32>
      %cst_10 = arith.constant dense<0.000000e+00> : vector<16xf32>
      %13 = vector.multi_reduction <add>, %12, %cst_10 [1] : vector<16x128xf32> to vector<16xf32>
      %14 = vector.shape_cast %13 : vector<16xf32> to vector<16x1xf32>
      %cst_11 = arith.constant 1.280000e+02 : f32
      %15 = vector.broadcast %cst_11 : f32 to vector<16x1xf32>
      %16 = arith.divf %14, %15 : vector<16x1xf32>
      %17 = vector.broadcast %16 : vector<16x1xf32> to vector<16x128xf32>
      %18 = arith.subf %12, %17 : vector<16x128xf32>
      %19 = arith.mulf %18, %18 : vector<16x128xf32>
      %cst_12 = arith.constant dense<0.000000e+00> : vector<16xf32>
      %20 = vector.multi_reduction <add>, %19, %cst_12 [1] : vector<16x128xf32> to vector<16xf32>
      %21 = vector.shape_cast %20 : vector<16xf32> to vector<16x1xf32>
      %cst_13 = arith.constant 1.280000e+02 : f32
      %22 = vector.broadcast %cst_13 : f32 to vector<16x1xf32>
      %23 = arith.divf %21, %22 : vector<16x1xf32>
      %cst_14 = arith.constant 9.99999974E-6 : f32
      %24 = vector.broadcast %cst_14 : f32 to vector<16x1xf32>
      %25 = arith.addf %23, %24 : vector<16x1xf32>
      %26 = math.rsqrt %25 : vector<16x1xf32>
      %27 = vector.broadcast %26 : vector<16x1xf32> to vector<16x128xf32>
      %28 = arith.mulf %18, %27 : vector<16x128xf32>
      %c0_15 = arith.constant 0 : index
      %c0_16 = arith.constant 0 : index
      %29 = vector.load %arg3[%c0_15, %c0_16] : memref<1x128xf32, #tpu.memory_space<vmem>>, vector<1x128xf32>
      %30 = vector.broadcast %29 : vector<1x128xf32> to vector<16x128xf32>
      %31 = arith.mulf %28, %30 : vector<16x128xf32>
      %c0_17 = arith.constant 0 : index
      %c0_18 = arith.constant 0 : index
      %32 = vector.load %arg4[%c0_17, %c0_18] : memref<1x128xf32, #tpu.memory_space<vmem>>, vector<1x128xf32>
      %33 = vector.broadcast %32 : vector<1x128xf32> to vector<16x128xf32>
      %34 = arith.addf %31, %33 : vector<16x128xf32>
      %35 = arith.truncf %34 : vector<16x128xf32> to vector<16x128xbf16>
      %c0_19 = arith.constant 0 : index
      %c0_20 = arith.constant 0 : index
      %36 = vector.load %arg8[%c0_19, %c0_20] : memref<16x128xbf16, #tpu.memory_space<vmem>>, vector<16x128xbf16>
      tpu.vector_store %arg8[%c0_19, %c0_20], %35 {strides = array<i32>} : memref<16x128xbf16, #tpu.memory_space<vmem>>, vector<16x128xbf16>,
    } else {
    }
    %c0 = arith.constant 0 : index
    %c0_1 = arith.constant 0 : index
    %3 = vector.load %arg8[%c0, %c0_1] : memref<16x128xbf16, #tpu.memory_space<vmem>>, vector<16x128xbf16>
    %c0_2 = arith.constant 0 : index
    %c0_3 = arith.constant 0 : index
    %4 = vector.load %arg5[%c0_2, %c0_3] : memref<128x384xbf16, #tpu.memory_space<vmem>>, vector<128x384xbf16>
    %cst = arith.constant dense<0.000000e+00> : vector<16x384xf32>
    %5 = tpu.matmul %3, %4, %cst {dimension_numbers = #tpu.dot_dimension_numbers<[1], [0], [0], [1], [0, 0, 1, 1], [], []>} : vector<16x128xbf16>, vector<128x384xbf16>, vector<16x384xf32> -> vector<16x384xf32>
    %c0_4 = arith.constant 0 : index
    %c0_5 = arith.constant 0 : index
    %6 = vector.load %arg6[%c0_4, %c0_5] : memref<1x384xf32, #tpu.memory_space<vmem>>, vector<1x384xf32>
    %7 = vector.broadcast %6 : vector<1x384xf32> to vector<16x384xf32>
    %8 = arith.addf %5, %7 : vector<16x384xf32>
    %9 = arith.truncf %8 : vector<16x384xf32> to vector<16x384xbf16>
    %c0_6 = arith.constant 0 : index
    %c0_7 = arith.constant 0 : index
    %10 = vector.load %arg7[%c0_6, %c0_7] : memref<16x384xbf16, #tpu.memory_space<vmem>>, vector<16x384xbf16>
    tpu.vector_store %arg7[%c0_6, %c0_7], %9 {strides = array<i32>} : memref<16x384xbf16, #tpu.memory_space<vmem>>, vector<16x384xbf16>,
    return
  }
  func.func @transform_0(%arg0: i32, %arg1: i32) -> (i32, i32) {
    %c0_i32 = arith.constant 0 : i32
    %c0_i32_0 = arith.constant 0 : i32
    return %arg0, %c0_i32 : i32, i32
  }
  func.func @transform_1(%arg0: i32, %arg1: i32) -> (i32, i32) {
    %c0_i32 = arith.constant 0 : i32
    %c0_i32_0 = arith.constant 0 : i32
    %c0_i32_1 = arith.constant 0 : i32
    return %c0_i32, %c0_i32_0 : i32, i32
  }
  func.func @transform_2(%arg0: i32, %arg1: i32) -> (i32, i32) {
    %c0_i32 = arith.constant 0 : i32
    %c0_i32_0 = arith.constant 0 : i32
    %c0_i32_1 = arith.constant 0 : i32
    return %c0_i32, %c0_i32_0 : i32, i32
  }
  func.func @transform_3(%arg0: i32, %arg1: i32) -> (i32, i32) {
    %c0_i32 = arith.constant 0 : i32
    %c0_i32_0 = arith.constant 0 : i32
    return %c0_i32, %arg1 : i32, i32
  }
  func.func @transform_4(%arg0: i32, %arg1: i32) -> (i32, i32) {
    %c0_i32 = arith.constant 0 : i32
    %c0_i32_0 = arith.constant 0 : i32
    return %c0_i32, %arg1 : i32, i32
  }
  func.func @transform_5(%arg0: i32, %arg1: i32) -> (i32, i32) {
    %c0_i32 = arith.constant 0 : i32
    return %arg0, %arg1 : i32, i32
  }
}

module attributes {stable_mosaic.version = 11 : i64} {
  func.func @_ln_matmul_kernel(%arg0: i32, %arg1: i32, %arg2: memref<16x128xbf16, #tpu.memory_space<vmem>>, %arg3: memref<1x128xf32, #tpu.memory_space<vmem>>, %arg4: memref<1x128xf32, #tpu.memory_space<vmem>>, %arg5: memref<128x512xbf16, #tpu.memory_space<vmem>>, %arg6: memref<1x512xf32, #tpu.memory_space<vmem>>, %arg7: memref<16x512xbf16, #tpu.memory_space<vmem>>, %arg8: memref<16x128xbf16, #tpu.memory_space<vmem>>) attributes {dimension_semantics = [#tpu.dimension_semantics<parallel>, #tpu.dimension_semantics<arbitrary>], iteration_bounds = array<i64: 1, 1>, scalar_prefetch = 0 : i64, scratch_operands = 1 : i64, tpu.core_type = #tpu.core_type<tc>, window_params = [{transform_indices = @transform_0, window_bounds = array<i64: 16, 128>}, {pipeline_mode = #tpu.pipeline_mode<synchronous>, transform_indices = @transform_1, window_bounds = array<i64: 1, 128>}, {pipeline_mode = #tpu.pipeline_mode<synchronous>, transform_indices = @transform_2, window_bounds = array<i64: 1, 128>}, {transform_indices = @transform_3, window_bounds = array<i64: 128, 512>}, {transform_indices = @transform_4, window_bounds = array<i64: 1, 512>}, {transform_indices = @transform_5, window_bounds = array<i64: 16, 512>}]} {
    %c0_i32 = arith.constant 0 : i32
    %0 = arith.cmpi eq, %arg1, %c0_i32 : i32
    %1 = arith.extui %0 : i1 to i32
    %c0_i32_0 = arith.constant 0 : i32
    %2 = arith.cmpi ne, %1, %c0_i32_0 : i32
    scf.if %2 {
      %c0_12 = arith.constant 0 : index
      %c0_13 = arith.constant 0 : index
      %24 = vector.load %arg2[%c0_12, %c0_13] : memref<16x128xbf16, #tpu.memory_space<vmem>>, vector<16x128xbf16>
      %25 = arith.extf %24 : vector<16x128xbf16> to vector<16x128xf32>
      %cst_14 = arith.constant dense<0.000000e+00> : vector<16xf32>
      %26 = vector.multi_reduction <add>, %25, %cst_14 [1] : vector<16x128xf32> to vector<16xf32>
      %27 = vector.shape_cast %26 : vector<16xf32> to vector<16x1xf32>
      %cst_15 = arith.constant 1.280000e+02 : f32
      %28 = vector.broadcast %cst_15 : f32 to vector<16x1xf32>
      %29 = arith.divf %27, %28 : vector<16x1xf32>
      %30 = vector.broadcast %29 : vector<16x1xf32> to vector<16x128xf32>
      %31 = arith.subf %25, %30 : vector<16x128xf32>
      %32 = arith.mulf %31, %31 : vector<16x128xf32>
      %cst_16 = arith.constant dense<0.000000e+00> : vector<16xf32>
      %33 = vector.multi_reduction <add>, %32, %cst_16 [1] : vector<16x128xf32> to vector<16xf32>
      %34 = vector.shape_cast %33 : vector<16xf32> to vector<16x1xf32>
      %cst_17 = arith.constant 1.280000e+02 : f32
      %35 = vector.broadcast %cst_17 : f32 to vector<16x1xf32>
      %36 = arith.divf %34, %35 : vector<16x1xf32>
      %cst_18 = arith.constant 9.99999974E-6 : f32
      %37 = vector.broadcast %cst_18 : f32 to vector<16x1xf32>
      %38 = arith.addf %36, %37 : vector<16x1xf32>
      %39 = math.rsqrt %38 : vector<16x1xf32>
      %40 = vector.broadcast %39 : vector<16x1xf32> to vector<16x128xf32>
      %41 = arith.mulf %31, %40 : vector<16x128xf32>
      %c0_19 = arith.constant 0 : index
      %c0_20 = arith.constant 0 : index
      %42 = vector.load %arg3[%c0_19, %c0_20] : memref<1x128xf32, #tpu.memory_space<vmem>>, vector<1x128xf32>
      %43 = vector.broadcast %42 : vector<1x128xf32> to vector<16x128xf32>
      %44 = arith.mulf %41, %43 : vector<16x128xf32>
      %c0_21 = arith.constant 0 : index
      %c0_22 = arith.constant 0 : index
      %45 = vector.load %arg4[%c0_21, %c0_22] : memref<1x128xf32, #tpu.memory_space<vmem>>, vector<1x128xf32>
      %46 = vector.broadcast %45 : vector<1x128xf32> to vector<16x128xf32>
      %47 = arith.addf %44, %46 : vector<16x128xf32>
      %48 = arith.truncf %47 : vector<16x128xf32> to vector<16x128xbf16>
      %c0_23 = arith.constant 0 : index
      %c0_24 = arith.constant 0 : index
      %49 = vector.load %arg8[%c0_23, %c0_24] : memref<16x128xbf16, #tpu.memory_space<vmem>>, vector<16x128xbf16>
      tpu.vector_store %arg8[%c0_23, %c0_24], %48 {strides = array<i32>} : memref<16x128xbf16, #tpu.memory_space<vmem>>, vector<16x128xbf16>,
    } else {
    }
    %c0 = arith.constant 0 : index
    %c0_1 = arith.constant 0 : index
    %3 = vector.load %arg8[%c0, %c0_1] : memref<16x128xbf16, #tpu.memory_space<vmem>>, vector<16x128xbf16>
    %c0_2 = arith.constant 0 : index
    %c0_3 = arith.constant 0 : index
    %4 = vector.load %arg5[%c0_2, %c0_3] : memref<128x512xbf16, #tpu.memory_space<vmem>>, vector<128x512xbf16>
    %cst = arith.constant dense<0.000000e+00> : vector<16x512xf32>
    %5 = tpu.matmul %3, %4, %cst {dimension_numbers = #tpu.dot_dimension_numbers<[1], [0], [0], [1], [0, 0, 1, 1], [], []>} : vector<16x128xbf16>, vector<128x512xbf16>, vector<16x512xf32> -> vector<16x512xf32>
    %c0_4 = arith.constant 0 : index
    %c0_5 = arith.constant 0 : index
    %6 = vector.load %arg6[%c0_4, %c0_5] : memref<1x512xf32, #tpu.memory_space<vmem>>, vector<1x512xf32>
    %7 = vector.broadcast %6 : vector<1x512xf32> to vector<16x512xf32>
    %8 = arith.addf %5, %7 : vector<16x512xf32>
    %cst_6 = arith.constant 5.000000e-01 : f32
    %9 = vector.broadcast %cst_6 : f32 to vector<16x512xf32>
    %10 = arith.mulf %9, %8 : vector<16x512xf32>
    %cst_7 = arith.constant 4.471500e-02 : f32
    %11 = vector.broadcast %cst_7 : f32 to vector<16x512xf32>
    %12 = arith.mulf %11, %8 : vector<16x512xf32>
    %13 = arith.mulf %12, %8 : vector<16x512xf32>
    %14 = arith.mulf %13, %8 : vector<16x512xf32>
    %15 = arith.addf %8, %14 : vector<16x512xf32>
    %cst_8 = arith.constant 0.797884583 : f32
    %16 = vector.broadcast %cst_8 : f32 to vector<16x512xf32>
    %17 = arith.mulf %16, %15 : vector<16x512xf32>
    %18 = math.tanh %17 : vector<16x512xf32>
    %cst_9 = arith.constant 1.000000e+00 : f32
    %19 = vector.broadcast %cst_9 : f32 to vector<16x512xf32>
    %20 = arith.addf %19, %18 : vector<16x512xf32>
    %21 = arith.mulf %10, %20 : vector<16x512xf32>
    %22 = arith.truncf %21 : vector<16x512xf32> to vector<16x512xbf16>
    %c0_10 = arith.constant 0 : index
    %c0_11 = arith.constant 0 : index
    %23 = vector.load %arg7[%c0_10, %c0_11] : memref<16x512xbf16, #tpu.memory_space<vmem>>, vector<16x512xbf16>
    tpu.vector_store %arg7[%c0_10, %c0_11], %22 {strides = array<i32>} : memref<16x512xbf16, #tpu.memory_space<vmem>>, vector<16x512xbf16>,
    return
  }
  func.func @transform_0(%arg0: i32, %arg1: i32) -> (i32, i32) {
    %c0_i32 = arith.constant 0 : i32
    %c0_i32_0 = arith.constant 0 : i32
    return %arg0, %c0_i32 : i32, i32
  }
  func.func @transform_1(%arg0: i32, %arg1: i32) -> (i32, i32) {
    %c0_i32 = arith.constant 0 : i32
    %c0_i32_0 = arith.constant 0 : i32
    %c0_i32_1 = arith.constant 0 : i32
    return %c0_i32, %c0_i32_0 : i32, i32
  }
  func.func @transform_2(%arg0: i32, %arg1: i32) -> (i32, i32) {
    %c0_i32 = arith.constant 0 : i32
    %c0_i32_0 = arith.constant 0 : i32
    %c0_i32_1 = arith.constant 0 : i32
    return %c0_i32, %c0_i32_0 : i32, i32
  }
  func.func @transform_3(%arg0: i32, %arg1: i32) -> (i32, i32) {
    %c0_i32 = arith.constant 0 : i32
    %c0_i32_0 = arith.constant 0 : i32
    return %c0_i32, %arg1 : i32, i32
  }
  func.func @transform_4(%arg0: i32, %arg1: i32) -> (i32, i32) {
    %c0_i32 = arith.constant 0 : i32
    %c0_i32_0 = arith.constant 0 : i32
    return %c0_i32, %arg1 : i32, i32
  }
  func.func @transform_5(%arg0: i32, %arg1: i32) -> (i32, i32) {
    %c0_i32 = arith.constant 0 : i32
    return %arg0, %arg1 : i32, i32
  }
}

module attributes {stable_mosaic.version = 11 : i64} {
  func.func @_attn_kernel(%arg0: i32, %arg1: i32, %arg2: i32, %arg3: memref<1x8x128xbf16, #tpu.memory_space<vmem>>, %arg4: memref<1x8x128xbf16, #tpu.memory_space<vmem>>, %arg5: memref<1x8x128xbf16, #tpu.memory_space<vmem>>, %arg6: memref<1x8x128xbf16, #tpu.memory_space<vmem>>) attributes {dimension_semantics = [#tpu.dimension_semantics<parallel>, #tpu.dimension_semantics<parallel>, #tpu.dimension_semantics<parallel>], iteration_bounds = array<i64: 2, 1, 1>, scalar_prefetch = 0 : i64, scratch_operands = 0 : i64, tpu.core_type = #tpu.core_type<tc>, window_params = [{transform_indices = @transform_0, window_bounds = array<i64: 1, 8, 128>}, {transform_indices = @transform_1, window_bounds = array<i64: 1, 8, 128>}, {transform_indices = @transform_2, window_bounds = array<i64: 1, 8, 128>}, {transform_indices = @transform_3, window_bounds = array<i64: 1, 8, 128>}]} {
    %0 = tpu.iota {dimensions = array<i32: 0>} : vector<8x8xi32>
    %c8_i32 = arith.constant 8 : i32
    %1 = arith.muli %arg2, %c8_i32 : i32
    %2 = vector.broadcast %1 : i32 to vector<8x8xi32>
    %3 = arith.addi %0, %2 : vector<8x8xi32>
    %4 = tpu.iota {dimensions = array<i32: 1>} : vector<8x8xi32>
    %5 = arith.cmpi sle, %4, %3 : vector<8x8xi32>
    %c0 = arith.constant 0 : index
    %c0_0 = arith.constant 0 : index
    %c0_1 = arith.constant 0 : index
    %6 = vector.load %arg3[%c0, %c0_0, %c0_1] : memref<1x8x128xbf16, #tpu.memory_space<vmem>>, vector<1x8x64xbf16>
    %7 = vector.shape_cast %6 : vector<1x8x64xbf16> to vector<8x64xbf16>
    %c0_2 = arith.constant 0 : index
    %c0_3 = arith.constant 0 : index
    %c0_4 = arith.constant 0 : index
    %8 = vector.load %arg4[%c0_2, %c0_3, %c0_4] : memref<1x8x128xbf16, #tpu.memory_space<vmem>>, vector<1x8x64xbf16>
    %9 = vector.shape_cast %8 : vector<1x8x64xbf16> to vector<8x64xbf16>
    %c0_5 = arith.constant 0 : index
    %c0_6 = arith.constant 0 : index
    %c0_7 = arith.constant 0 : index
    %10 = vector.load %arg5[%c0_5, %c0_6, %c0_7] : memref<1x8x128xbf16, #tpu.memory_space<vmem>>, vector<1x8x64xbf16>
    %11 = vector.shape_cast %10 : vector<1x8x64xbf16> to vector<8x64xbf16>
    %cst = arith.constant dense<0.000000e+00> : vector<8x8xf32>
    %12 = tpu.matmul %7, %9, %cst {dimension_numbers = #tpu.dot_dimension_numbers<[1], [1], [0], [0], [0, 0, 1, 0], [], []>} : vector<8x64xbf16>, vector<8x64xbf16>, vector<8x8xf32> -> vector<8x8xf32>
    %cst_8 = arith.constant 1.250000e-01 : f32
    %13 = vector.broadcast %cst_8 : f32 to vector<8x8xf32>
    %14 = arith.mulf %12, %13 : vector<8x8xf32>
    %cst_9 = arith.constant -1.000000e+30 : f32
    %15 = vector.broadcast %cst_9 : f32 to vector<8x8xf32>
    %16 = arith.select %5, %14, %15 : vector<8x8xi1>, vector<8x8xf32>
    %cst_10 = arith.constant dense<0xFF800000> : vector<8xf32>
    %17 = vector.multi_reduction <maximumf>, %16, %cst_10 [1] : vector<8x8xf32> to vector<8xf32>
    %18 = vector.shape_cast %17 : vector<8xf32> to vector<8x1xf32>
    %19 = vector.broadcast %18 : vector<8x1xf32> to vector<8x8xf32>
    %20 = arith.subf %16, %19 : vector<8x8xf32>
    %21 = math.exp %20 : vector<8x8xf32>
    %cst_11 = arith.constant dense<0.000000e+00> : vector<8xf32>
    %22 = vector.multi_reduction <add>, %21, %cst_11 [1] : vector<8x8xf32> to vector<8xf32>
    %23 = vector.shape_cast %22 : vector<8xf32> to vector<8x1xf32>
    %24 = tpu.reciprocal %23 {approx = true} : vector<8x1xf32> -> vector<8x1xf32>
    %25 = vector.broadcast %24 : vector<8x1xf32> to vector<8x8xf32>
    %26 = arith.mulf %21, %25 : vector<8x8xf32>
    %27 = arith.truncf %26 : vector<8x8xf32> to vector<8x8xbf16>
    %cst_12 = arith.constant dense<0.000000e+00> : vector<8x64xf32>
    %28 = tpu.matmul %27, %11, %cst_12 {dimension_numbers = #tpu.dot_dimension_numbers<[1], [0], [0], [1], [0, 0, 1, 1], [], []>} : vector<8x8xbf16>, vector<8x64xbf16>, vector<8x64xf32> -> vector<8x64xf32>
    %c0_13 = arith.constant 0 : index
    %c0_14 = arith.constant 0 : index
    %c64 = arith.constant 64 : index
    %29 = vector.load %arg3[%c0_13, %c0_14, %c64] : memref<1x8x128xbf16, #tpu.memory_space<vmem>>, vector<1x8x64xbf16>
    %30 = vector.shape_cast %29 : vector<1x8x64xbf16> to vector<8x64xbf16>
    %c0_15 = arith.constant 0 : index
    %c0_16 = arith.constant 0 : index
    %c64_17 = arith.constant 64 : index
    %31 = vector.load %arg4[%c0_15, %c0_16, %c64_17] : memref<1x8x128xbf16, #tpu.memory_space<vmem>>, vector<1x8x64xbf16>
    %32 = vector.shape_cast %31 : vector<1x8x64xbf16> to vector<8x64xbf16>
    %c0_18 = arith.constant 0 : index
    %c0_19 = arith.constant 0 : index
    %c64_20 = arith.constant 64 : index
    %33 = vector.load %arg5[%c0_18, %c0_19, %c64_20] : memref<1x8x128xbf16, #tpu.memory_space<vmem>>, vector<1x8x64xbf16>
    %34 = vector.shape_cast %33 : vector<1x8x64xbf16> to vector<8x64xbf16>
    %cst_21 = arith.constant dense<0.000000e+00> : vector<8x8xf32>
    %35 = tpu.matmul %30, %32, %cst_21 {dimension_numbers = #tpu.dot_dimension_numbers<[1], [1], [0], [0], [0, 0, 1, 0], [], []>} : vector<8x64xbf16>, vector<8x64xbf16>, vector<8x8xf32> -> vector<8x8xf32>
    %cst_22 = arith.constant 1.250000e-01 : f32
    %36 = vector.broadcast %cst_22 : f32 to vector<8x8xf32>
    %37 = arith.mulf %35, %36 : vector<8x8xf32>
    %cst_23 = arith.constant -1.000000e+30 : f32
    %38 = vector.broadcast %cst_23 : f32 to vector<8x8xf32>
    %39 = arith.select %5, %37, %38 : vector<8x8xi1>, vector<8x8xf32>
    %cst_24 = arith.constant dense<0xFF800000> : vector<8xf32>
    %40 = vector.multi_reduction <maximumf>, %39, %cst_24 [1] : vector<8x8xf32> to vector<8xf32>
    %41 = vector.shape_cast %40 : vector<8xf32> to vector<8x1xf32>
    %42 = vector.broadcast %41 : vector<8x1xf32> to vector<8x8xf32>
    %43 = arith.subf %39, %42 : vector<8x8xf32>
    %44 = math.exp %43 : vector<8x8xf32>
    %cst_25 = arith.constant dense<0.000000e+00> : vector<8xf32>
    %45 = vector.multi_reduction <add>, %44, %cst_25 [1] : vector<8x8xf32> to vector<8xf32>
    %46 = vector.shape_cast %45 : vector<8xf32> to vector<8x1xf32>
    %47 = tpu.reciprocal %46 {approx = true} : vector<8x1xf32> -> vector<8x1xf32>
    %48 = vector.broadcast %47 : vector<8x1xf32> to vector<8x8xf32>
    %49 = arith.mulf %44, %48 : vector<8x8xf32>
    %50 = arith.truncf %49 : vector<8x8xf32> to vector<8x8xbf16>
    %cst_26 = arith.constant dense<0.000000e+00> : vector<8x64xf32>
    %51 = tpu.matmul %50, %34, %cst_26 {dimension_numbers = #tpu.dot_dimension_numbers<[1], [0], [0], [1], [0, 0, 1, 1], [], []>} : vector<8x8xbf16>, vector<8x64xbf16>, vector<8x64xf32> -> vector<8x64xf32>
    %52 = tpu.concatenate %28, %51 in 1 : vector<8x64xf32>, vector<8x64xf32> -> vector<8x128xf32>
    %53 = arith.truncf %52 : vector<8x128xf32> to vector<8x128xbf16>
    %c0_27 = arith.constant 0 : index
    %c0_28 = arith.constant 0 : index
    %c0_29 = arith.constant 0 : index
    %54 = vector.load %arg6[%c0_27, %c0_28, %c0_29] : memref<1x8x128xbf16, #tpu.memory_space<vmem>>, vector<1x8x128xbf16>
    %55 = vector.shape_cast %54 : vector<1x8x128xbf16> to vector<8x128xbf16>
    %56 = vector.shape_cast %53 : vector<8x128xbf16> to vector<1x8x128xbf16>
    tpu.vector_store %arg6[%c0_27, %c0_28, %c0_29], %56 {strides = array<i32>} : memref<1x8x128xbf16, #tpu.memory_space<vmem>>, vector<1x8x128xbf16>,
    return
  }
  func.func @transform_0(%arg0: i32, %arg1: i32, %arg2: i32) -> (i32, i32, i32) {
    %c0_i32 = arith.constant 0 : i32
    return %arg0, %arg2, %arg1 : i32, i32, i32
  }
  func.func @transform_1(%arg0: i32, %arg1: i32, %arg2: i32) -> (i32, i32, i32) {
    %c1_i32 = arith.constant 1 : i32
    %0 = arith.addi %c1_i32, %arg1 : i32
    %c0_i32 = arith.constant 0 : i32
    %c0_i32_0 = arith.constant 0 : i32
    return %arg0, %c0_i32, %0 : i32, i32, i32
  }
  func.func @transform_2(%arg0: i32, %arg1: i32, %arg2: i32) -> (i32, i32, i32) {
    %c2_i32 = arith.constant 2 : i32
    %0 = arith.addi %c2_i32, %arg1 : i32
    %c0_i32 = arith.constant 0 : i32
    %c0_i32_0 = arith.constant 0 : i32
    return %arg0, %c0_i32, %0 : i32, i32, i32
  }
  func.func @transform_3(%arg0: i32, %arg1: i32, %arg2: i32) -> (i32, i32, i32) {
    %c0_i32 = arith.constant 0 : i32
    return %arg0, %arg2, %arg1 : i32, i32, i32
  }
}

module attributes {stable_mosaic.version = 11 : i64} {
  func.func @_matmul_kernel(%arg0: i32, %arg1: i32, %arg2: memref<16x512xbf16, #tpu.memory_space<vmem>>, %arg3: memref<512x128xbf16, #tpu.memory_space<vmem>>, %arg4: memref<1x128xf32, #tpu.memory_space<vmem>>, %arg5: memref<16x128xbf16, #tpu.memory_space<vmem>>, %arg6: memref<16x128xbf16, #tpu.memory_space<vmem>>) attributes {dimension_semantics = [#tpu.dimension_semantics<parallel>, #tpu.dimension_semantics<parallel>], iteration_bounds = array<i64: 1, 1>, scalar_prefetch = 0 : i64, scratch_operands = 0 : i64, tpu.core_type = #tpu.core_type<tc>, window_params = [{transform_indices = @transform_0, window_bounds = array<i64: 16, 512>}, {transform_indices = @transform_1, window_bounds = array<i64: 512, 128>}, {transform_indices = @transform_2, window_bounds = array<i64: 1, 128>}, {transform_indices = @transform_3, window_bounds = array<i64: 16, 128>}, {transform_indices = @transform_4, window_bounds = array<i64: 16, 128>}]} {
    %c0 = arith.constant 0 : index
    %c0_0 = arith.constant 0 : index
    %0 = vector.load %arg2[%c0, %c0_0] : memref<16x512xbf16, #tpu.memory_space<vmem>>, vector<16x512xbf16>
    %c0_1 = arith.constant 0 : index
    %c0_2 = arith.constant 0 : index
    %1 = vector.load %arg3[%c0_1, %c0_2] : memref<512x128xbf16, #tpu.memory_space<vmem>>, vector<512x128xbf16>
    %cst = arith.constant dense<0.000000e+00> : vector<16x128xf32>
    %2 = tpu.matmul %0, %1, %cst {dimension_numbers = #tpu.dot_dimension_numbers<[1], [0], [0], [1], [0, 0, 1, 1], [], []>} : vector<16x512xbf16>, vector<512x128xbf16>, vector<16x128xf32> -> vector<16x128xf32>
    %c0_3 = arith.constant 0 : index
    %c0_4 = arith.constant 0 : index
    %3 = vector.load %arg4[%c0_3, %c0_4] : memref<1x128xf32, #tpu.memory_space<vmem>>, vector<1x128xf32>
    %4 = vector.broadcast %3 : vector<1x128xf32> to vector<16x128xf32>
    %5 = arith.addf %2, %4 : vector<16x128xf32>
    %c0_5 = arith.constant 0 : index
    %c0_6 = arith.constant 0 : index
    %6 = vector.load %arg5[%c0_5, %c0_6] : memref<16x128xbf16, #tpu.memory_space<vmem>>, vector<16x128xbf16>
    %7 = arith.extf %6 : vector<16x128xbf16> to vector<16x128xf32>
    %8 = arith.addf %5, %7 : vector<16x128xf32>
    %9 = arith.truncf %8 : vector<16x128xf32> to vector<16x128xbf16>
    %c0_7 = arith.constant 0 : index
    %c0_8 = arith.constant 0 : index
    %10 = vector.load %arg6[%c0_7, %c0_8] : memref<16x128xbf16, #tpu.memory_space<vmem>>, vector<16x128xbf16>
    tpu.vector_store %arg6[%c0_7, %c0_8], %9 {strides = array<i32>} : memref<16x128xbf16, #tpu.memory_space<vmem>>, vector<16x128xbf16>,
    return
  }
  func.func @transform_0(%arg0: i32, %arg1: i32) -> (i32, i32) {
    %c0_i32 = arith.constant 0 : i32
    %c0_i32_0 = arith.constant 0 : i32
    return %arg0, %c0_i32 : i32, i32
  }
  func.func @transform_1(%arg0: i32, %arg1: i32) -> (i32, i32) {
    %c0_i32 = arith.constant 0 : i32
    %c0_i32_0 = arith.constant 0 : i32
    return %c0_i32, %arg1 : i32, i32
  }
  func.func @transform_2(%arg0: i32, %arg1: i32) -> (i32, i32) {
    %c0_i32 = arith.constant 0 : i32
    %c0_i32_0 = arith.constant 0 : i32
    return %c0_i32, %arg1 : i32, i32
  }
  func.func @transform_3(%arg0: i32, %arg1: i32) -> (i32, i32) {
    %c0_i32 = arith.constant 0 : i32
    return %arg0, %arg1 : i32, i32
  }
  func.func @transform_4(%arg0: i32, %arg1: i32) -> (i32, i32) {
    %c0_i32 = arith.constant 0 : i32
    return %arg0, %arg1 : i32, i32
  }
}

module attributes {stable_mosaic.version = 11 : i64} {
  func.func @_final_ln_critic_kernel(%arg0: i32, %arg1: memref<16x128xbf16, #tpu.memory_space<vmem>>, %arg2: memref<1x128xf32, #tpu.memory_space<vmem>>, %arg3: memref<1x128xf32, #tpu.memory_space<vmem>>, %arg4: memref<1x128xf32, #tpu.memory_space<vmem>>, %arg5: memref<1x1xf32, #tpu.memory_space<vmem>>, %arg6: memref<16x128xbf16, #tpu.memory_space<vmem>>, %arg7: memref<16x128xf32, #tpu.memory_space<vmem>>) attributes {dimension_semantics = [#tpu.dimension_semantics<parallel>], iteration_bounds = array<i64: 1>, scalar_prefetch = 0 : i64, scratch_operands = 0 : i64, tpu.core_type = #tpu.core_type<tc>, window_params = [{transform_indices = @transform_0, window_bounds = array<i64: 16, 128>}, {pipeline_mode = #tpu.pipeline_mode<synchronous>, transform_indices = @transform_1, window_bounds = array<i64: 1, 128>}, {pipeline_mode = #tpu.pipeline_mode<synchronous>, transform_indices = @transform_2, window_bounds = array<i64: 1, 128>}, {pipeline_mode = #tpu.pipeline_mode<synchronous>, transform_indices = @transform_3, window_bounds = array<i64: 1, 128>}, {pipeline_mode = #tpu.pipeline_mode<synchronous>, transform_indices = @transform_4, window_bounds = array<i64: 1, 1>}, {transform_indices = @transform_5, window_bounds = array<i64: 16, 128>}, {transform_indices = @transform_6, window_bounds = array<i64: 16, 128>}]} {
    %c0 = arith.constant 0 : index
    %c0_0 = arith.constant 0 : index
    %0 = vector.load %arg1[%c0, %c0_0] : memref<16x128xbf16, #tpu.memory_space<vmem>>, vector<16x128xbf16>
    %1 = arith.extf %0 : vector<16x128xbf16> to vector<16x128xf32>
    %cst = arith.constant dense<0.000000e+00> : vector<16xf32>
    %2 = vector.multi_reduction <add>, %1, %cst [1] : vector<16x128xf32> to vector<16xf32>
    %3 = vector.shape_cast %2 : vector<16xf32> to vector<16x1xf32>
    %cst_1 = arith.constant 1.280000e+02 : f32
    %4 = vector.broadcast %cst_1 : f32 to vector<16x1xf32>
    %5 = arith.divf %3, %4 : vector<16x1xf32>
    %6 = vector.broadcast %5 : vector<16x1xf32> to vector<16x128xf32>
    %7 = arith.subf %1, %6 : vector<16x128xf32>
    %8 = arith.mulf %7, %7 : vector<16x128xf32>
    %cst_2 = arith.constant dense<0.000000e+00> : vector<16xf32>
    %9 = vector.multi_reduction <add>, %8, %cst_2 [1] : vector<16x128xf32> to vector<16xf32>
    %10 = vector.shape_cast %9 : vector<16xf32> to vector<16x1xf32>
    %cst_3 = arith.constant 1.280000e+02 : f32
    %11 = vector.broadcast %cst_3 : f32 to vector<16x1xf32>
    %12 = arith.divf %10, %11 : vector<16x1xf32>
    %cst_4 = arith.constant 9.99999974E-6 : f32
    %13 = vector.broadcast %cst_4 : f32 to vector<16x1xf32>
    %14 = arith.addf %12, %13 : vector<16x1xf32>
    %15 = math.rsqrt %14 : vector<16x1xf32>
    %16 = vector.broadcast %15 : vector<16x1xf32> to vector<16x128xf32>
    %17 = arith.mulf %7, %16 : vector<16x128xf32>
    %c0_5 = arith.constant 0 : index
    %c0_6 = arith.constant 0 : index
    %18 = vector.load %arg2[%c0_5, %c0_6] : memref<1x128xf32, #tpu.memory_space<vmem>>, vector<1x128xf32>
    %19 = vector.broadcast %18 : vector<1x128xf32> to vector<16x128xf32>
    %20 = arith.mulf %17, %19 : vector<16x128xf32>
    %c0_7 = arith.constant 0 : index
    %c0_8 = arith.constant 0 : index
    %21 = vector.load %arg3[%c0_7, %c0_8] : memref<1x128xf32, #tpu.memory_space<vmem>>, vector<1x128xf32>
    %22 = vector.broadcast %21 : vector<1x128xf32> to vector<16x128xf32>
    %23 = arith.addf %20, %22 : vector<16x128xf32>
    %24 = arith.truncf %23 : vector<16x128xf32> to vector<16x128xbf16>
    %c0_9 = arith.constant 0 : index
    %c0_10 = arith.constant 0 : index
    %25 = vector.load %arg6[%c0_9, %c0_10] : memref<16x128xbf16, #tpu.memory_space<vmem>>, vector<16x128xbf16>
    tpu.vector_store %arg6[%c0_9, %c0_10], %24 {strides = array<i32>} : memref<16x128xbf16, #tpu.memory_space<vmem>>, vector<16x128xbf16>,
    %c0_11 = arith.constant 0 : index
    %c0_12 = arith.constant 0 : index
    %26 = vector.load %arg4[%c0_11, %c0_12] : memref<1x128xf32, #tpu.memory_space<vmem>>, vector<1x128xf32>
    %27 = vector.broadcast %26 : vector<1x128xf32> to vector<16x128xf32>
    %28 = arith.mulf %23, %27 : vector<16x128xf32>
    %cst_13 = arith.constant dense<0.000000e+00> : vector<16xf32>
    %29 = vector.multi_reduction <add>, %28, %cst_13 [1] : vector<16x128xf32> to vector<16xf32>
    %30 = vector.shape_cast %29 : vector<16xf32> to vector<16x1xf32>
    %c0_14 = arith.constant 0 : index
    %c0_15 = arith.constant 0 : index
    %31 = vector.load %arg5[%c0_14, %c0_15] : memref<1x1xf32, #tpu.memory_space<vmem>>, vector<1x1xf32>
    %32 = vector.broadcast %31 : vector<1x1xf32> to vector<16x1xf32>
    %33 = arith.addf %30, %32 : vector<16x1xf32>
    %34 = vector.shape_cast %33 : vector<16x1xf32> to vector<16x1xf32>
    %35 = vector.broadcast %34 : vector<16x1xf32> to vector<16x128xf32>
    %c0_16 = arith.constant 0 : index
    %c0_17 = arith.constant 0 : index
    %36 = vector.load %arg7[%c0_16, %c0_17] : memref<16x128xf32, #tpu.memory_space<vmem>>, vector<16x128xf32>
    tpu.vector_store %arg7[%c0_16, %c0_17], %35 {strides = array<i32>} : memref<16x128xf32, #tpu.memory_space<vmem>>, vector<16x128xf32>,
    return
  }
  func.func @transform_0(%arg0: i32) -> (i32, i32) {
    %c0_i32 = arith.constant 0 : i32
    %c0_i32_0 = arith.constant 0 : i32
    return %arg0, %c0_i32 : i32, i32
  }
  func.func @transform_1(%arg0: i32) -> (i32, i32) {
    %c0_i32 = arith.constant 0 : i32
    %c0_i32_0 = arith.constant 0 : i32
    %c0_i32_1 = arith.constant 0 : i32
    return %c0_i32, %c0_i32_0 : i32, i32
  }
  func.func @transform_2(%arg0: i32) -> (i32, i32) {
    %c0_i32 = arith.constant 0 : i32
    %c0_i32_0 = arith.constant 0 : i32
    %c0_i32_1 = arith.constant 0 : i32
    return %c0_i32, %c0_i32_0 : i32, i32
  }
  func.func @transform_3(%arg0: i32) -> (i32, i32) {
    %c0_i32 = arith.constant 0 : i32
    %c0_i32_0 = arith.constant 0 : i32
    %c0_i32_1 = arith.constant 0 : i32
    return %c0_i32, %c0_i32_0 : i32, i32
  }
  func.func @transform_4(%arg0: i32) -> (i32, i32) {
    %c0_i32 = arith.constant 0 : i32
    %c0_i32_0 = arith.constant 0 : i32
    %c0_i32_1 = arith.constant 0 : i32
    return %c0_i32, %c0_i32_0 : i32, i32
  }
  func.func @transform_5(%arg0: i32) -> (i32, i32) {
    %c0_i32 = arith.constant 0 : i32
    %c0_i32_0 = arith.constant 0 : i32
    return %arg0, %c0_i32 : i32, i32
  }
  func.func @transform_6(%arg0: i32) -> (i32, i32) {
    %c0_i32 = arith.constant 0 : i32
    %c0_i32_0 = arith.constant 0 : i32
    return %arg0, %c0_i32 : i32, i32
  }
}

module attributes {stable_mosaic.version = 11 : i64} {
  func.func @_matmul_kernel(%arg0: i32, %arg1: i32, %arg2: memref<16x128xbf16, #tpu.memory_space<vmem>>, %arg3: memref<128x256xbf16, #tpu.memory_space<vmem>>, %arg4: memref<1x256xf32, #tpu.memory_space<vmem>>, %arg5: memref<16x256xf32, #tpu.memory_space<vmem>>) attributes {dimension_semantics = [#tpu.dimension_semantics<parallel>, #tpu.dimension_semantics<parallel>], iteration_bounds = array<i64: 1, 1>, scalar_prefetch = 0 : i64, scratch_operands = 0 : i64, tpu.core_type = #tpu.core_type<tc>, window_params = [{transform_indices = @transform_0, window_bounds = array<i64: 16, 128>}, {transform_indices = @transform_1, window_bounds = array<i64: 128, 256>}, {transform_indices = @transform_2, window_bounds = array<i64: 1, 256>}, {transform_indices = @transform_3, window_bounds = array<i64: 16, 256>}]} {
    %c0 = arith.constant 0 : index
    %c0_0 = arith.constant 0 : index
    %0 = vector.load %arg2[%c0, %c0_0] : memref<16x128xbf16, #tpu.memory_space<vmem>>, vector<16x128xbf16>
    %c0_1 = arith.constant 0 : index
    %c0_2 = arith.constant 0 : index
    %1 = vector.load %arg3[%c0_1, %c0_2] : memref<128x256xbf16, #tpu.memory_space<vmem>>, vector<128x256xbf16>
    %cst = arith.constant dense<0.000000e+00> : vector<16x256xf32>
    %2 = tpu.matmul %0, %1, %cst {dimension_numbers = #tpu.dot_dimension_numbers<[1], [0], [0], [1], [0, 0, 1, 1], [], []>} : vector<16x128xbf16>, vector<128x256xbf16>, vector<16x256xf32> -> vector<16x256xf32>
    %c0_3 = arith.constant 0 : index
    %c0_4 = arith.constant 0 : index
    %3 = vector.load %arg4[%c0_3, %c0_4] : memref<1x256xf32, #tpu.memory_space<vmem>>, vector<1x256xf32>
    %4 = vector.broadcast %3 : vector<1x256xf32> to vector<16x256xf32>
    %5 = arith.addf %2, %4 : vector<16x256xf32>
    %c0_5 = arith.constant 0 : index
    %c0_6 = arith.constant 0 : index
    %6 = vector.load %arg5[%c0_5, %c0_6] : memref<16x256xf32, #tpu.memory_space<vmem>>, vector<16x256xf32>
    tpu.vector_store %arg5[%c0_5, %c0_6], %5 {strides = array<i32>} : memref<16x256xf32, #tpu.memory_space<vmem>>, vector<16x256xf32>,
    return
  }
  func.func @transform_0(%arg0: i32, %arg1: i32) -> (i32, i32) {
    %c0_i32 = arith.constant 0 : i32
    %c0_i32_0 = arith.constant 0 : i32
    return %arg0, %c0_i32 : i32, i32
  }
  func.func @transform_1(%arg0: i32, %arg1: i32) -> (i32, i32) {
    %c0_i32 = arith.constant 0 : i32
    %c0_i32_0 = arith.constant 0 : i32
    return %c0_i32, %arg1 : i32, i32
  }
  func.func @transform_2(%arg0: i32, %arg1: i32) -> (i32, i32) {
    %c0_i32 = arith.constant 0 : i32
    %c0_i32_0 = arith.constant 0 : i32
    return %c0_i32, %arg1 : i32, i32
  }
  func.func @transform_3(%arg0: i32, %arg1: i32) -> (i32, i32) {
    %c0_i32 = arith.constant 0 : i32
    return %arg0, %arg1 : i32, i32
  }
}

</mosaic_0001>

<bundles_post_ra>
// kernel: forward.13
= control target key start
LH: loop header
LB: loop body
LE: loop exit
PB: predicated region body
PF: predicated region fallthrough
CT: control target
= control target key end

     0   :  { %s678_s12 = smov 0   ;;  %s680_s13 = smov 0   ;;  %s741_s0 = inlined_call_operand.vmem [shape: bf16[2,8,384], index: 0, kind: input, shape index: {}, may-alias: {0,1,2}]   ;;  %s742_s1 = inlined_call_operand.vmem [shape: bf16[2,8,384], index: 1, kind: input, shape index: {}, may-alias: {0,1,2}]   ;;  %s743_s2 = inlined_call_operand.vmem [shape: bf16[2,8,384], index: 2, kind: input, shape index: {}, may-alias: {0,1,2}]   ;;  %s744_s3 = inlined_call_operand.vmem [shape: bf16[2,8,128], index: 3, kind: output, shape index: {}]  }
   0x1   :  { %s682_s14 = smov 0  }
   0x2 LB: > { %s32_s15 = sadd.s32 1, %s651_s13  ;;  %p582_p0 = scmp.ge.s32.totalorder %s655_s14, 1  ;;  %s655_s14 = sphi %s682_s14, %s13_s14   ;;  %s651_s13 = sphi %s680_s13, %s746_s13   ;;  %s647_s12 = sphi %s678_s12, %s745_s12  }
   0x3   : > { %p34_p1 = scmp.ge.s32.totalorder %s32_s15, 2  ;;  %p209_p2 = scmp.lt.s32.totalorder %s655_s14, 3 }
   0x5   : > { %s748_s15 = smov (%p34_p1, %s32_s15), 0  ;;  %p210_p3 = pnand %p582_p0, %p209_p2 }
   0x6   : > { %p263_p4 = scmp.lt.s32.totalorder (!%p210_p3), %s647_s12, 1  ;;  %s657_s24 = smov (!%p210_p3), 64  }
   0x7   : > { %213 = sbr.rel (%p210_p3) target bundleno = 788 (0x314), region = 32 }
   0xc   : > { %s750_s12 = smov (!%p263_p4, %s647_s12), 1  ;;  %vm317_vm0 = vcmask 523264   ;;  %v306_v12 = vlaneseq  ;;  %vm339_vm2 = vcmask 64512   ;;  %vm355_vm3 = vcmask 1043456  }
   0xd   : > { %s699_s16 = smul.u32 12, %s750_s12  ;;  %s586_s29 = sshll.u32 %s750_s12, 2 }
   0xe   : > { %v307_v13 = vshrl.u32 %v306_v12, 7  ;;  %v312_v14 = vand.u32 127, %v306_v12  ;;  %s304_s5 = scalar_lea.vmem %s744_s3, %s586_s29 }
   0xf   : > { %s594_s17 = sadd.s32 4, %s699_s16  ;;  %s274_s23 = scalar_lea.vmem %s741_s0, %s699_s16 }
  0x10   : > { %s283_s20 = scalar_lea.vmem %s742_s1, %s594_s17  ;;  %v314_v2 = vld [vmem:[%s274_s23] sm:$0xf]  ;;  %vm313_vm1 = vcmp.le.s32.totalorder %v312_v14, %v307_v13  ;;  %s596_s25 = sadd.s32 8, %s699_s16 }
  0x11   : > { %v315_v0 = vld [vmem:[%s283_s20] sm:$0xf]  ;;  %v373_v4 = vunpack.c.l.b16 %v314_v2  ;;  %s293_s28 = scalar_lea.vmem %s743_s2, %s596_s25 }
  0x12   : > { %v378_v1 = vunpack.c.l.b16 %v315_v0  ;;  %v322_v6 = vsel %vm317_vm0, %v315_v0, 0  ;;  %v316_v33 = vld [vmem:[%s293_s28] sm:$0xf] }
  0x13   : > { %v374_v5 = vpack.c.b16 %v373_v4, %v373_v4  ;;  %331 = vmatpush.bf16.xpose.msra.mxu0 %v322_v6  ;;  %v416_v34 = vunpack.c.l.b16 %v316_v33  ;;  %v357_v36 = vsel %vm355_vm3, %v316_v33, 0 }
  0x14   : > { %v379_v3 = vpack.c.b16 %v378_v1, %v378_v1  ;;  %366 = vmatpush.bf16.msra.mxu1 %v357_v36 }
  0x15   : > { %v417_v35 = vpack.c.b16 %v416_v34, %v416_v34 }
  0x16   : > { %380 = vrot.lane.b32.xlu0 %v379_v3, %s657_s24 }
  0x1a   : > { %587 = vmatmul.msk.bf16.vlgmr.msra.gmra.mxu0 %vm317_vm0, %v314_v2 }
  0x1e   : > { %375 = vrot.lane.b32.xlu0 %v374_v5, %s657_s24 }
  0x88   : > { %v381_v7 = vpop.permute.xlu0 %380 }
  0x89   : > { %v386_v8 = vsel %vm317_vm0, %v381_v7, 0 }
  0x8a   : > { %395 = vmatpush.bf16.xpose.msra.mxu2 %v386_v8 }
  0x90   : > { %v376_v9 = vpop.permute.xlu0 %375 }
  0x91   : > { %589 = vmatmul.msk.bf16.vlgmr.msra.gmra.mxu2 %vm317_vm0, %v376_v9 }
  0x97   : > { %v333_v10 = vpop.f32.mrf.mxu0 }
  0x98   : > { %v337_v18 = vmul.f32 0.125, %v333_v10 }
  0x9a   : > { %v338_v20 = vsel %vm313_vm1, %v337_v18, -1e+30 }
  0x9b   : > { %v340_v22 = vsel %vm339_vm2, %v338_v20, -inf }
  0x9f   : > { %v335_v11 = vpop.f32.mrf.mxu0 }
 0x114   : > { %v397_v15 = vpop.f32.mrf.mxu2 }
 0x115   : > { %v401_v16 = vmul.f32 0.125, %v397_v15 }
 0x117   : > { %v402_v17 = vsel %vm313_vm1, %v401_v16, -1e+30 }
 0x118   : > { %v403_v19 = vsel %vm339_vm2, %v402_v17, -inf }
 0x119   : > { %404 = vmax.xlane.f32.xlu1 %v403_v19 }
 0x11c   : > { %v399_v21 = vpop.f32.mrf.mxu2 }
 0x121   : > { %341 = vmax.xlane.f32.xlu1 %v340_v22 }
 0x18c   : > { %v405_v23 = vpop.xlane.xlu1 %404 }
 0x18d   : > { %v406_v24 = vsub.f32 %v402_v17, %v405_v23 }
 0x18f   : > { %v407_v25 = vmul.f32 1.442695, %v406_v24 }
 0x191   : > { %625 = vpow2.f32 %v407_v25 }
 0x194   : > { %v342_v26 = vpop.xlane.xlu1 %341 }
 0x195   : > { %v343_v27 = vsub.f32 %v338_v20, %v342_v26 }
 0x197   : > { %v626_v28 = vpop.eup %625  ;;  %v344_v29 = vmul.f32 1.442695, %v343_v27 }
 0x198   : > { %v409_v30 = vsel %vm339_vm2, %v626_v28, 0.0 }
 0x199   : > { %627 = vpow2.f32 %v344_v29  ;;  %410 = vadd.xlane.f32.xlu2 %v409_v30 }
 0x19f   : > { %v628_v31 = vpop.eup %627 }
 0x1a0   : > { %v346_v32 = vsel %vm339_vm2, %v628_v31, 0.0 }
 0x1a1   : > { %347 = vadd.xlane.f32.xlu0 %v346_v32 }
 0x1b1   : > { %418 = vrot.lane.b32.xlu2 %v417_v35, %s657_s24 }
 0x20c   : > { %v411_v37 = vpop.xlane.xlu2 %410 }
 0x20d   : > { %629 = vrcp.f32 %v411_v37 }
 0x213   : > { %v630_v38 = vpop.eup %629 }
 0x214   : > { %v419_v39 = vpop.permute.xlu2 %418  ;;  %v348_v40 = vpop.xlane.xlu0 %347  ;;  %v413_v41 = vmul.f32 %v630_v38, %v626_v28 }
 0x215   : > { %631 = vrcp.f32 %v348_v40  ;;  %v424_v42 = vsel %vm355_vm3, %v419_v39, 0 }
 0x216   : > { %433 = vmatpush.bf16.msra.mxu3 %v424_v42  ;;  %v414_v43 = vpack.c.bf16 %v413_v41, %v413_v41 }
 0x219   : > { %590 = vmatmul.msk.bf16.vlgmr.msra.gmra.mxu3 %vm339_vm2, %v414_v43 }
 0x21b   : > { %v632_v44 = vpop.eup %631 }
 0x21c   : > { %v350_v45 = vmul.f32 %v632_v44, %v628_v31 }
 0x21e   : > { %v351_v46 = vpack.c.bf16 %v350_v45, %v350_v45 }
 0x220   : > { %588 = vmatmul.msk.bf16.vlgmr.msra.gmra.mxu1 %vm339_vm2, %v351_v46 }
 0x29c   : > { %v435_v47 = vpop.f32.mrf.mxu3 }
 0x29d   : > { %440 = vrot.lane.b32.xlu1 %v435_v47, %s657_s24  ;;  %v368_v48 = vpop.f32.mrf.mxu1 }
 0x2a4   : > { %v437_v49 = vpop.f32.mrf.mxu3 }
 0x2a5   : > { %v370_v50 = vpop.f32.mrf.mxu1 }
 0x30f   : > { %v441_v51 = vpop.permute.xlu1 %440 }
 0x310   : > { %v443_v52 = vsel %vm317_vm0, %v368_v48, %v441_v51 }
 0x311   : > { %v444_v53 = vpack.c.bf16 %v443_v52, %v443_v52 }
 0x313   : > { %445 = vst [vmem:[%s304_s5] sm:$0xf] %v444_v53 }
 0x314 PF: > { %s13_s14 = sadd.s32 1, %s655_s14   ;;  %s745_s12 = smov %s651_s13 }
 0x315   : > { %p10_p5 = scmp.ge.s32.totalorder %s13_s14, 4   ;;  %s746_s13 = smov %s748_s15 }
 0x317   :  { %12 = sbr.rel (!%p10_p5) target bundleno = 2 (0x2), region = 68 }

// kernel: forward.14
= control target key start
LH: loop header
LB: loop body
LE: loop exit
PB: predicated region body
PF: predicated region fallthrough
CT: control target
= control target key end

     0   :  { %9 = vsyncpa [#allocation3], 0  ;;  %s222_s18 = smov [#allocation2]   ;;  %s223_s20 = smov 64   ;;  %s265_s0 = inlined_call_operand.vmem [shape: bf16[16,128], index: 0, kind: input, shape index: {}]   ;;  %s266_s1 = inlined_call_operand.hbm [shape: bf16[128,128], index: 1, kind: input, shape index: {}]   ;;  %s267_s2 = inlined_call_operand.vmem [shape: f32[1,128], index: 2, kind: input, shape index: {}]   ;;  %s268_s3 = inlined_call_operand.vmem [shape: bf16[16,128], index: 3, kind: input, shape index: {}]   ;;  %s269_s4 = inlined_call_operand.vmem [shape: bf16[16,128], index: 4, kind: output, shape index: {}]  }
   0x1   :  { %s16_s17 = sshll.u32 %s266_s1, 4  ;;  %s18_s19 = sshll.u32 %s222_s18, 4  ;;  %s17_s17 = int_to_ptr.hbm [resolvable:$true] %s16_s17  ;;  %s19_s19 = int_to_ptr.vmem [resolvable:$true] %s18_s19 }
   0x2   :  { %s224_s21 = smov 4  }
   0x3   :  { %24 = dma.hbm_to_vmem [thread:$0]  %s17_s17, 1024, %s19_s19, [#allocation3], %s223_s20, %s223_s20, %s224_s21  }
   0x4   :  { %220 = dma.done.wait [#allocation3], 1024  }
   0x5   :  { %221 = vsyncadd [#allocation3], 4294966272  ;;  %v182_v0 = vld [vmem:[#allocation2 + $0x38] sm:$0xff]  ;;  %v181_v1 = vld [vmem:[#allocation2 + $0x30] sm:$0xff] }
   0x6   :  { %109 = vmatpush.bf16.msra.mxu0 %v182_v0  ;;  %v180_v2 = vld [vmem:[#allocation2 + $0x28] sm:$0xff]  ;;  %v179_v3 = vld [vmem:[#allocation2 + $0x20] sm:$0xff]  ;;  %v178_v4 = vld [vmem:[#allocation2 + $0x18] sm:$0xff] }
   0x7   :  { %v177_v5 = vld [vmem:[#allocation2 + $0x10] sm:$0xff]  ;;  %v176_v6 = vld [vmem:[#allocation2 + $0x8] sm:$0xff]  ;;  %v175_v7 = vld [vmem:[#allocation2] sm:$0xff] }
   0x8   :  { %v174_v8 = vld [vmem:[%s265_s0] sm:$0xff] }
   0x9   :  { %v195_v10 = vld [vmem:[%s267_s2] ss:$0 sm:$0xff] }
   0xa   :  { %110 = vmatpush.bf16.msra.mxu0 %v181_v1  ;;  %v184_v11 = vld [vmem:[%s268_s3] sm:$0xff]  }
   0xb   :  { %v185_v13 = vunpack.c.l.bf16 %v184_v11  ;;  %v186_v14 = vunpack.c.h.bf16 %v184_v11 }
   0xe   :  { %111 = vmatpush.bf16.msra.mxu0 %v180_v2 }
  0x12   :  { %112 = vmatpush.bf16.msra.mxu0 %v179_v3 }
  0x16   :  { %113 = vmatpush.bf16.msra.mxu0 %v178_v4 }
  0x1a   :  { %114 = vmatpush.bf16.msra.mxu0 %v177_v5 }
  0x1e   :  { %115 = vmatpush.bf16.msra.mxu0 %v176_v6 }
  0x22   :  { %116 = vmatpush.bf16.msra.mxu0 %v175_v7 }
  0x25   :  { %117 = vmatmul.bf16.vlgmr.msra.gmra.mxu0 %v174_v8 }
  0xa2   :  { %v118_v9 = vpop.f32.mrf.mxu0 }
  0xa3   :  { %v119_v12 = vadd.f32 %v195_v10, %v118_v9 }
  0xa5   :  { %v127_v17 = vadd.f32 %v185_v13, %v119_v12 }
  0xaa   :  { %v120_v15 = vpop.f32.mrf.mxu0 }
  0xab   :  { %v121_v16 = vadd.f32 %v195_v10, %v120_v15 }
  0xad   :  { %v128_v18 = vadd.f32 %v186_v14, %v121_v16 }
  0xaf   :  { %v190_v19 = vpack.c.bf16 %v128_v18, %v127_v17 }
  0xb1   :  { %191 = vst [vmem:[%s269_s4] sm:$0xff] %v190_v19  }
  0xb2   :  { %137 = vsyncpa [#allocation3], 1 }

// kernel: forward.12
= control target key start
LH: loop header
LB: loop body
LE: loop exit
PB: predicated region body
PF: predicated region fallthrough
CT: control target
= control target key end

     0   :  { %10 = vsyncpa [#allocation4], 0  ;;  %s510_s21 = smov [#allocation3]   ;;  %s511_s23 = smov 192   ;;  %s587_s0 = inlined_call_operand.vmem [shape: bf16[16,128], index: 0, kind: input, shape index: {}]   ;;  %s588_s1 = inlined_call_operand.vmem [shape: f32[1,128], index: 1, kind: input, shape index: {}]   ;;  %s589_s2 = inlined_call_operand.vmem [shape: f32[1,128], index: 2, kind: input, shape index: {}]   ;;  %s590_s3 = inlined_call_operand.hbm [shape: bf16[128,384], index: 3, kind: input, shape index: {}]   ;;  %s591_s4 = inlined_call_operand.vmem [shape: f32[1,384], index: 4, kind: input, shape index: {}]   ;;  %s592_s5 = inlined_call_operand.vmem [shape: bf16[16,384], index: 5, kind: output, shape index: {}]  }
   0x1   :  { %s21_s20 = sshll.u32 %s590_s3, 4  ;;  %s23_s22 = sshll.u32 %s510_s21, 4  ;;  %s22_s20 = int_to_ptr.hbm [resolvable:$true] %s21_s20  ;;  %s24_s22 = int_to_ptr.vmem [resolvable:$true] %s23_s22 }
   0x2   :  { %s512_s24 = smov 12  }
   0x3   :  { %29 = dma.hbm_to_vmem [thread:$0]  %s22_s20, 3072, %s24_s22, [#allocation4], %s511_s23, %s511_s23, %s512_s24  }
   0x4   :  { %508 = dma.done.wait [#allocation4], 3072  }
   0x5   :  { %509 = vsyncadd [#allocation4], 4294964224  ;;  %v464_v0 = vld [vmem:[%s587_s0] sm:$0xff]   ;;  %v513_v3 = vmov 128.0   ;;  %v428_v18 = vld [vmem:[#allocation3 + $0xa8] sm:$0xf] }
   0x6   :  { %v465_v1 = vunpack.c.l.bf16 %v464_v0  ;;  %v466_v2 = vunpack.c.h.bf16 %v464_v0  ;;  %478 = vrcp.f32 %v513_v3  ;;  %v461_v19 = vld [vmem:[#allocation3 + $0xb0] sm:$0xf0]  ;;  %v460_v20 = vld [vmem:[#allocation3 + $0xac] sm:$0xf]  ;;  %v430_v22 = vld [vmem:[#allocation3 + $0xb4] sm:$0xf0] }
   0x7   :  { %v429_v21 = vor.u32 %v461_v19, %v428_v18  ;;  %v436_v23 = vld [vmem:[#allocation3 + $0xb0] sm:$0xf]  ;;  %v462_v24 = vld [vmem:[#allocation3 + $0xb8] sm:$0xf0]  ;;  %v433_v25 = vor.u32 %v460_v20, %v430_v22  ;;  %v457_v29 = vld [vmem:[#allocation3 + $0x94] sm:$0xf] }
   0x8   :  { %44 = vadd.xlane.f32.xlu0 %v465_v1  ;;  %v437_v26 = vor.u32 %v462_v24, %v436_v23  ;;  %v416_v27 = vld [vmem:[#allocation3 + $0x90] sm:$0xf]  ;;  %v458_v28 = vld [vmem:[#allocation3 + $0x98] sm:$0xf0]  ;;  %v418_v31 = vld [vmem:[#allocation3 + $0x9c] sm:$0xf0] }
   0x9   :  { %283 = vmatpush.bf16.msra.mxu0 %v429_v21  ;;  %297 = vmatpush.bf16.msra.mxu1 %v433_v25  ;;  %v417_v30 = vor.u32 %v458_v28, %v416_v27  ;;  %v424_v32 = vld [vmem:[#allocation3 + $0x98] sm:$0xf]  ;;  %v459_v33 = vld [vmem:[#allocation3 + $0xa0] sm:$0xf0]  ;;  %v421_v34 = vor.u32 %v457_v29, %v418_v31  ;;  %v454_v38 = vld [vmem:[#allocation3 + $0x7c] sm:$0xf] }
   0xa   :  { %311 = vmatpush.bf16.msra.mxu2 %v437_v26  ;;  %v425_v35 = vor.u32 %v459_v33, %v424_v32  ;;  %v404_v36 = vld [vmem:[#allocation3 + $0x78] sm:$0xf]  ;;  %v455_v37 = vld [vmem:[#allocation3 + $0x80] sm:$0xf0]  ;;  %v406_v40 = vld [vmem:[#allocation3 + $0x84] sm:$0xf0] }
   0xb   :  { %v405_v39 = vor.u32 %v455_v37, %v404_v36  ;;  %v412_v41 = vld [vmem:[#allocation3 + $0x80] sm:$0xf]  ;;  %v456_v42 = vld [vmem:[#allocation3 + $0x88] sm:$0xf0]  ;;  %v409_v43 = vor.u32 %v454_v38, %v406_v40  ;;  %v451_v47 = vld [vmem:[#allocation3 + $0x64] sm:$0xf] }
   0xc   :  { %v479_v4 = vpop.eup %478  ;;  %v413_v44 = vor.u32 %v456_v42, %v412_v41  ;;  %v392_v45 = vld [vmem:[#allocation3 + $0x60] sm:$0xf]  ;;  %v452_v46 = vld [vmem:[#allocation3 + $0x68] sm:$0xf0]  ;;  %v394_v49 = vld [vmem:[#allocation3 + $0x6c] sm:$0xf0] }
   0xd   :  { %v49_v5 = vmul.f32 128.0, %v479_v4  ;;  %vm53_vm0 = vweird.f32 %v479_v4  ;;  %284 = vmatpush.bf16.msra.mxu0 %v417_v30  ;;  %298 = vmatpush.bf16.msra.mxu1 %v421_v34  ;;  %v393_v48 = vor.u32 %v452_v46, %v392_v45  ;;  %v400_v50 = vld [vmem:[#allocation3 + $0x68] sm:$0xf]  ;;  %v453_v51 = vld [vmem:[#allocation3 + $0x70] sm:$0xf0]  ;;  %v397_v52 = vor.u32 %v451_v47, %v394_v49 }
   0xe   :  { %312 = vmatpush.bf16.msra.mxu2 %v425_v35  ;;  %v401_v53 = vor.u32 %v453_v51, %v400_v50  ;;  %v380_v54 = vld [vmem:[#allocation3 + $0x48] sm:$0xf]  ;;  %v449_v55 = vld [vmem:[#allocation3 + $0x50] sm:$0xf0]  ;;  %v448_v56 = vld [vmem:[#allocation3 + $0x4c] sm:$0xf] }
   0xf   :  { %v50_v6 = vsub.f32 1.0, %v49_v5  ;;  %v381_v57 = vor.u32 %v449_v55, %v380_v54  ;;  %v382_v58 = vld [vmem:[#allocation3 + $0x54] sm:$0xf0]  ;;  %v388_v59 = vld [vmem:[#allocation3 + $0x50] sm:$0xf] }
  0x10   :  { %46 = vadd.xlane.f32.xlu0 %v466_v2  ;;  %v450_v60 = vld [vmem:[#allocation3 + $0x58] sm:$0xf0]  ;;  %v385_v62 = vor.u32 %v448_v56, %v382_v58  ;;  %v445_v3 = vld [vmem:[#allocation3 + $0x34] sm:$0xf]  ;;  %v358_v18 = vld [vmem:[#allocation3 + $0x24] sm:$0xf0] }
  0x11   :  { %v51_v7 = vmul.f32 %v479_v4, %v50_v6  ;;  %285 = vmatpush.bf16.msra.mxu0 %v405_v39  ;;  %299 = vmatpush.bf16.msra.mxu1 %v409_v43  ;;  %v389_v63 = vor.u32 %v450_v60, %v388_v59  ;;  %v370_v6 = vld [vmem:[#allocation3 + $0x3c] sm:$0xf0]  ;;  %v444_v20 = vld [vmem:[#allocation3 + $0x28] sm:$0xf0]  ;;  %v439_v26 = vld [vmem:[#allocation3 + $0x4] sm:$0xf] }
  0x12   :  { %313 = vmatpush.bf16.msra.mxu2 %v413_v44  ;;  %v364_v19 = vld [vmem:[#allocation3 + $0x20] sm:$0xf]  ;;  %v440_v25 = vld [vmem:[#allocation3 + $0x8] sm:$0xf0]  ;;  %v346_v29 = vld [vmem:[#allocation3 + $0xc] sm:$0xf0] }
  0x13   :  { %v52_v8 = vadd.f32 %v479_v4, %v51_v7  ;;  %v376_v7 = vld [vmem:[#allocation3 + $0x38] sm:$0xf]  ;;  %v365_v23 = vor.u32 %v444_v20, %v364_v19  ;;  %v344_v24 = vld [vmem:[#allocation3] sm:$0xf]  ;;  %v352_v30 = vld [vmem:[#allocation3 + $0x8] sm:$0xf]  ;;  %v349_v32 = vor.u32 %v439_v26, %v346_v29 }
  0x14   :  { %v345_v28 = vor.u32 %v440_v25, %v344_v24  ;;  %v441_v31 = vld [vmem:[#allocation3 + $0x10] sm:$0xf0]  ;;  %v476_v46 = vld [vmem:[%s588_s1] ss:$0 sm:$0xff] }
  0x15   :  { %v550_v9 = vsel %vm53_vm0, %v479_v4, %v52_v8  ;;  %286 = vmatpush.bf16.msra.mxu0 %v393_v48  ;;  %300 = vmatpush.bf16.msra.mxu1 %v397_v52  ;;  %v373_v8 = vor.u32 %v445_v3, %v370_v6  ;;  %v353_v35 = vor.u32 %v441_v31, %v352_v30  ;;  %v477_v50 = vld [vmem:[%s589_s2] ss:$0 sm:$0xff] }
  0x16   :  { %314 = vmatpush.bf16.msra.mxu2 %v401_v53 }
  0x19   :  { %287 = vmatpush.bf16.msra.mxu0 %v381_v57  ;;  %301 = vmatpush.bf16.msra.mxu1 %v385_v62 }
  0x1a   :  { %315 = vmatpush.bf16.msra.mxu2 %v389_v63 }
  0x1d   :  { %302 = vmatpush.bf16.msra.mxu1 %v373_v8 }
  0x7b   :  { %v45_v10 = vpop.xlane.xlu0 %44 }
  0x7c   :  { %v55_v11 = vmul.f32 %v550_v9, %v45_v10  ;;  %v447_v10 = vld [vmem:[#allocation3 + $0x40] sm:$0xf0] }
  0x7e   :  { %v553_v12 = vsub.f32 %v465_v1, %v55_v11  ;;  %v368_v1 = vld [vmem:[#allocation3 + $0x30] sm:$0xf]  ;;  %v377_v11 = vor.u32 %v447_v10, %v376_v7 }
  0x80   :  { %v59_v13 = vmul.f32 %v553_v12, %v553_v12  ;;  %316 = vmatpush.bf16.msra.mxu2 %v377_v11 }
  0x82   :  { %61 = vadd.xlane.f32.xlu1 %v59_v13  ;;  %v356_v13 = vld [vmem:[#allocation3 + $0x18] sm:$0xf] }
  0x83   :  { %v47_v14 = vpop.xlane.xlu0 %46 }
  0x84   :  { %v56_v15 = vmul.f32 %v550_v9, %v47_v14  ;;  %v443_v14 = vld [vmem:[#allocation3 + $0x20] sm:$0xf0]  ;;  %317 = vmatpush.bf16.msra.mxu2 %v365_v23 }
  0x86   :  { %v558_v16 = vsub.f32 %v466_v2, %v56_v15  ;;  %v446_v2 = vld [vmem:[#allocation3 + $0x38] sm:$0xf0] }
  0x87   :  { %v369_v5 = vor.u32 %v446_v2, %v368_v1  ;;  %v442_v15 = vld [vmem:[#allocation3 + $0x1c] sm:$0xf] }
  0x88   :  { %v60_v17 = vmul.f32 %v558_v16, %v558_v16  ;;  %v361_v22 = vor.u32 %v442_v15, %v358_v18  ;;  %318 = vmatpush.bf16.msra.mxu2 %v353_v35 }
  0x89   :  { %288 = vmatpush.bf16.msra.mxu0 %v369_v5 }
  0x8a   :  { %63 = vadd.xlane.f32.xlu1 %v60_v17  ;;  %v357_v17 = vor.u32 %v443_v14, %v356_v13  ;;  %303 = vmatpush.bf16.msra.mxu1 %v361_v22 }
  0x8d   :  { %289 = vmatpush.bf16.msra.mxu0 %v357_v17 }
  0x8e   :  { %304 = vmatpush.bf16.msra.mxu1 %v349_v32 }
  0x91   :  { %290 = vmatpush.bf16.msra.mxu0 %v345_v28 }
  0xf5   :  { %v62_v61 = vpop.xlane.xlu1 %61 }
  0xf6   :  { %v65_v0 = vmul.f32 %v62_v61, %v550_v9 }
  0xf8   :  { %v67_v4 = vadd.f32 1e-05, %v65_v0 }
  0xfa   :  { %480 = vrsqrt.f32 %v67_v4  ;;  %vm75_vm2 = vweird.f32 %v67_v4 }
  0xfd   :  { %v64_v21 = vpop.xlane.xlu1 %63 }
  0xfe   :  { %v66_v27 = vmul.f32 %v64_v21, %v550_v9 }
 0x100   :  { %v481_v33 = vpop.eup %480  ;;  %v68_v34 = vadd.f32 1e-05, %v66_v27 }
 0x101   :  { %v70_v36 = vmul.f32 %v481_v33, %v67_v4  ;;  %vm76_vm1 = vweird.f32 %v481_v33 }
 0x102   :  { %482 = vrsqrt.f32 %v68_v34  ;;  %vm77_vm3 = vmor %vm75_vm2, %vm76_vm1  ;;  %vm85_vm5 = vweird.f32 %v68_v34 }
 0x103   :  { %v71_v37 = vmul.f32 %v481_v33, %v70_v36 }
 0x105   :  { %v72_v38 = vmul.f32 0.5, %v71_v37 }
 0x107   :  { %v73_v39 = vsub.f32 1.5, %v72_v38 }
 0x108   :  { %v483_v9 = vpop.eup %482 }
 0x109   :  { %v74_v40 = vmul.f32 %v481_v33, %v73_v39  ;;  %v80_v41 = vmul.f32 %v483_v9, %v68_v34  ;;  %vm86_vm4 = vweird.f32 %v483_v9 }
 0x10a   :  { %vm87_vm6 = vmor %vm85_vm5, %vm86_vm4 }
 0x10b   :  { %v81_v42 = vmul.f32 %v483_v9, %v80_v41  ;;  %v78_v43 = vsel %vm77_vm3, %v481_v33, %v74_v40 }
 0x10c   :  { %v89_v47 = vmul.f32 %v78_v43, %v553_v12  ;;  %v141_v12 = vld [vmem:[%s591_s4] sm:$0x7] }
 0x10d   :  { %v82_v44 = vmul.f32 0.5, %v81_v42  ;;  %v143_v58 = vperm.slane %v141_v12, 0  ;;  %v144_v59 = vperm.slane %v141_v12, 1  ;;  %v145_v0 = vperm.slane %v141_v12, 2 }
 0x10e   :  { %v95_v51 = vmul.f32 %v476_v46, %v89_v47 }
 0x10f   :  { %v83_v45 = vsub.f32 1.5, %v82_v44 }
 0x110   :  { %v101_v54 = vadd.f32 %v477_v50, %v95_v51 }
 0x111   :  { %v84_v48 = vmul.f32 %v483_v9, %v83_v45 }
 0x113   :  { %v88_v49 = vsel %vm87_vm6, %v483_v9, %v84_v48 }
 0x114   :  { %v90_v52 = vmul.f32 %v88_v49, %v558_v16 }
 0x116   :  { %v96_v53 = vmul.f32 %v476_v46, %v90_v52 }
 0x118   :  { %v102_v55 = vadd.f32 %v477_v50, %v96_v53 }
 0x11a   :  { %v470_v56 = vpack.c.bf16 %v102_v55, %v101_v54 }
 0x11c   :  { %471 = vst [vmem:[#allocation2] sm:$0xff] %v470_v56  }
 0x123   :  { %v438_v57 = vld [vmem:[#allocation2] sm:$0xff] }
 0x124   :  { %291 = vmatmul.bf16.vlgmr.msra.gmra.mxu0 %v438_v57  ;;  %305 = vmatmul.bf16.vlgmr.msra.gmra.mxu1 %v438_v57 }
 0x125   :  { %319 = vmatmul.bf16.vlgmr.msra.gmra.mxu2 %v438_v57 }
 0x1a1   :  { %v292_v60 = vpop.f32.mrf.mxu0  ;;  %v306_v61 = vpop.f32.mrf.mxu1 }
 0x1a2   :  { %v293_v62 = vadd.f32 %v292_v60, %v143_v58  ;;  %v307_v63 = vadd.f32 %v306_v61, %v144_v59 }
 0x1a4   :  { %v325_v16 = vpack.c.bf16 %v307_v63, %v293_v62 }
 0x1a6   :  { %329 = vst [vmem:[%s592_s5] sm:$0xff] %v325_v16 }
 0x1a8   :  { %v320_v1 = vpop.f32.mrf.mxu2 }
 0x1a9   :  { %v321_v2 = vadd.f32 %v320_v1, %v145_v0  ;;  %v294_v3 = vpop.f32.mrf.mxu0  ;;  %v308_v4 = vpop.f32.mrf.mxu1 }
 0x1aa   :  { %v295_v5 = vadd.f32 %v294_v3, %v143_v58  ;;  %v309_v6 = vadd.f32 %v308_v4, %v144_v59 }
 0x1ab   :  { %v326_v7 = vpack.c.bf16 %v321_v2, %v321_v2 }
 0x1ac   :  { %v327_v8 = vpack.c.bf16 %v309_v6, %v295_v5 }
 0x1ad   :  { %330 = vst [vmem:[%s592_s5 + $0x8] sm:$0xf] %v326_v7 }
 0x1ae   :  { %331 = vst [vmem:[%s592_s5 + $0xc] sm:$0xff] %v327_v8 }
 0x1b0   :  { %v322_v10 = vpop.f32.mrf.mxu2 }
 0x1b1   :  { %v323_v11 = vadd.f32 %v322_v10, %v145_v0 }
 0x1b3   :  { %v328_v13 = vpack.c.bf16 %v323_v11, %v323_v11 }
 0x1b5   :  { %332 = vst [vmem:[%s592_s5 + $0x14] sm:$0xf] %v328_v13 }
 0x1b6   :  { %337 = vsyncpa [#allocation4], 1 }

// kernel: forward.15
= control target key start
LH: loop header
LB: loop body
LE: loop exit
PB: predicated region body
PF: predicated region fallthrough
CT: control target
= control target key end

     0   :  { %10 = vsyncpa [#allocation4], 0  ;;  %s686_s21 = smov [#allocation3]   ;;  %s687_s23 = smov 256   ;;  %s782_s0 = inlined_call_operand.vmem [shape: bf16[16,128], index: 0, kind: input, shape index: {}]   ;;  %s783_s1 = inlined_call_operand.vmem [shape: f32[1,128], index: 1, kind: input, shape index: {}]   ;;  %s784_s2 = inlined_call_operand.vmem [shape: f32[1,128], index: 2, kind: input, shape index: {}]   ;;  %s785_s3 = inlined_call_operand.hbm [shape: bf16[128,512], index: 3, kind: input, shape index: {}]   ;;  %s786_s4 = inlined_call_operand.vmem [shape: f32[1,512], index: 4, kind: input, shape index: {}]   ;;  %s787_s5 = inlined_call_operand.vmem [shape: bf16[16,512], index: 5, kind: output, shape index: {}]  }
   0x1   :  { %s21_s20 = sshll.u32 %s785_s3, 4  ;;  %s23_s22 = sshll.u32 %s686_s21, 4  ;;  %s22_s20 = int_to_ptr.hbm [resolvable:$true] %s21_s20  ;;  %s24_s22 = int_to_ptr.vmem [resolvable:$true] %s23_s22 }
   0x2   :  { %s688_s24 = smov 16  }
   0x3   :  { %29 = dma.hbm_to_vmem [thread:$0]  %s22_s20, 4096, %s24_s22, [#allocation4], %s687_s23, %s687_s23, %s688_s24  }
   0x4   :  { %684 = dma.done.wait [#allocation4], 4096  }
   0x5   :  { %685 = vsyncadd [#allocation4], 4294963200  ;;  %v624_v0 = vld [vmem:[%s782_s0] sm:$0xff]   ;;  %v689_v3 = vmov 128.0   ;;  %v576_v18 = vld [vmem:[#allocation3 + $0xe0] sm:$0xf] }
   0x6   :  { %v625_v1 = vunpack.c.l.bf16 %v624_v0  ;;  %v626_v2 = vunpack.c.h.bf16 %v624_v0  ;;  %638 = vrcp.f32 %v689_v3  ;;  %v621_v19 = vld [vmem:[#allocation3 + $0xec] sm:$0xf0]  ;;  %v619_v20 = vld [vmem:[#allocation3 + $0xe4] sm:$0xf]  ;;  %v578_v22 = vld [vmem:[#allocation3 + $0xf0] sm:$0xf0] }
   0x7   :  { %v577_v21 = vor.u32 %v621_v19, %v576_v18  ;;  %v584_v23 = vld [vmem:[#allocation3 + $0xe8] sm:$0xf]  ;;  %v622_v24 = vld [vmem:[#allocation3 + $0xf4] sm:$0xf0]  ;;  %v581_v25 = vor.u32 %v619_v20, %v578_v22  ;;  %v620_v27 = vld [vmem:[#allocation3 + $0xec] sm:$0xf] }
   0x8   :  { %44 = vadd.xlane.f32.xlu0 %v625_v1  ;;  %v585_v26 = vor.u32 %v622_v24, %v584_v23  ;;  %v586_v28 = vld [vmem:[#allocation3 + $0xf8] sm:$0xf0]  ;;  %v560_v30 = vld [vmem:[#allocation3 + $0xc0] sm:$0xf]  ;;  %v617_v31 = vld [vmem:[#allocation3 + $0xcc] sm:$0xf0] }
   0x9   :  { %317 = vmatpush.bf16.msra.mxu0 %v577_v21  ;;  %v589_v29 = vor.u32 %v620_v27, %v586_v28  ;;  %331 = vmatpush.bf16.msra.mxu1 %v581_v25  ;;  %v615_v32 = vld [vmem:[#allocation3 + $0xc4] sm:$0xf]  ;;  %v561_v33 = vor.u32 %v617_v31, %v560_v30  ;;  %v562_v34 = vld [vmem:[#allocation3 + $0xd0] sm:$0xf0]  ;;  %v568_v35 = vld [vmem:[#allocation3 + $0xc8] sm:$0xf] }
   0xa   :  { %345 = vmatpush.bf16.msra.mxu2 %v585_v26  ;;  %v618_v36 = vld [vmem:[#allocation3 + $0xd4] sm:$0xf0]  ;;  %v565_v37 = vor.u32 %v615_v32, %v562_v34  ;;  %v616_v39 = vld [vmem:[#allocation3 + $0xcc] sm:$0xf]  ;;  %v570_v40 = vld [vmem:[#allocation3 + $0xd8] sm:$0xf0] }
   0xb   :  { %359 = vmatpush.bf16.msra.mxu3 %v589_v29  ;;  %v569_v38 = vor.u32 %v618_v36, %v568_v35  ;;  %v573_v41 = vor.u32 %v616_v39, %v570_v40  ;;  %v544_v42 = vld [vmem:[#allocation3 + $0xa0] sm:$0xf]  ;;  %v613_v43 = vld [vmem:[#allocation3 + $0xac] sm:$0xf0]  ;;  %v611_v44 = vld [vmem:[#allocation3 + $0xa4] sm:$0xf] }
   0xc   :  { %v639_v4 = vpop.eup %638  ;;  %v545_v45 = vor.u32 %v613_v43, %v544_v42  ;;  %v546_v46 = vld [vmem:[#allocation3 + $0xb0] sm:$0xf0]  ;;  %v552_v47 = vld [vmem:[#allocation3 + $0xa8] sm:$0xf]  ;;  %v614_v48 = vld [vmem:[#allocation3 + $0xb4] sm:$0xf0] }
   0xd   :  { %v49_v5 = vmul.f32 128.0, %v639_v4  ;;  %vm53_vm0 = vweird.f32 %v639_v4  ;;  %318 = vmatpush.bf16.msra.mxu0 %v561_v33  ;;  %332 = vmatpush.bf16.msra.mxu1 %v565_v37  ;;  %v549_v49 = vor.u32 %v611_v44, %v546_v46  ;;  %v553_v50 = vor.u32 %v614_v48, %v552_v47  ;;  %v612_v51 = vld [vmem:[#allocation3 + $0xac] sm:$0xf]  ;;  %v554_v52 = vld [vmem:[#allocation3 + $0xb8] sm:$0xf0] }
   0xe   :  { %346 = vmatpush.bf16.msra.mxu2 %v569_v38  ;;  %v557_v53 = vor.u32 %v612_v51, %v554_v52  ;;  %v528_v54 = vld [vmem:[#allocation3 + $0x80] sm:$0xf]  ;;  %v609_v55 = vld [vmem:[#allocation3 + $0x8c] sm:$0xf0]  ;;  %v607_v56 = vld [vmem:[#allocation3 + $0x84] sm:$0xf] }
   0xf   :  { %v50_v6 = vsub.f32 1.0, %v49_v5  ;;  %360 = vmatpush.bf16.msra.mxu3 %v573_v41  ;;  %v529_v57 = vor.u32 %v609_v55, %v528_v54  ;;  %v530_v58 = vld [vmem:[#allocation3 + $0x90] sm:$0xf0]  ;;  %v536_v59 = vld [vmem:[#allocation3 + $0x88] sm:$0xf] }
  0x10   :  { %46 = vadd.xlane.f32.xlu0 %v626_v2  ;;  %v610_v60 = vld [vmem:[#allocation3 + $0x94] sm:$0xf0]  ;;  %v533_v61 = vor.u32 %v607_v56, %v530_v58  ;;  %v608_v63 = vld [vmem:[#allocation3 + $0x8c] sm:$0xf]  ;;  %v538_v0 = vld [vmem:[#allocation3 + $0x98] sm:$0xf0] }
  0x11   :  { %v51_v7 = vmul.f32 %v639_v4, %v50_v6  ;;  %319 = vmatpush.bf16.msra.mxu0 %v545_v45  ;;  %333 = vmatpush.bf16.msra.mxu1 %v549_v49  ;;  %v537_v62 = vor.u32 %v610_v60, %v536_v59  ;;  %v605_v3 = vld [vmem:[#allocation3 + $0x6c] sm:$0xf0]  ;;  %v514_v6 = vld [vmem:[#allocation3 + $0x70] sm:$0xf0]  ;;  %v496_v19 = vld [vmem:[#allocation3 + $0x40] sm:$0xf] }
  0x12   :  { %347 = vmatpush.bf16.msra.mxu2 %v553_v50  ;;  %v601_v20 = vld [vmem:[#allocation3 + $0x4c] sm:$0xf0]  ;;  %v599_v21 = vld [vmem:[#allocation3 + $0x44] sm:$0xf]  ;;  %v498_v24 = vld [vmem:[#allocation3 + $0x50] sm:$0xf0] }
  0x13   :  { %v52_v8 = vadd.f32 %v639_v4, %v51_v7  ;;  %361 = vmatpush.bf16.msra.mxu3 %v557_v53  ;;  %v520_v7 = vld [vmem:[#allocation3 + $0x68] sm:$0xf]  ;;  %v497_v23 = vor.u32 %v601_v20, %v496_v19  ;;  %v501_v26 = vor.u32 %v599_v21, %v498_v24  ;;  %v602_v27 = vld [vmem:[#allocation3 + $0x54] sm:$0xf0]  ;;  %v600_v28 = vld [vmem:[#allocation3 + $0x4c] sm:$0xf] }
  0x14   :  { %v504_v25 = vld [vmem:[#allocation3 + $0x48] sm:$0xf]  ;;  %v506_v29 = vld [vmem:[#allocation3 + $0x58] sm:$0xf0]  ;;  %v480_v32 = vld [vmem:[#allocation3 + $0x20] sm:$0xf] }
  0x15   :  { %v726_v9 = vsel %vm53_vm0, %v639_v4, %v52_v8  ;;  %320 = vmatpush.bf16.msra.mxu0 %v529_v57  ;;  %334 = vmatpush.bf16.msra.mxu1 %v533_v61  ;;  %v603_v4 = vld [vmem:[#allocation3 + $0x64] sm:$0xf]  ;;  %v606_v8 = vld [vmem:[#allocation3 + $0x74] sm:$0xf0]  ;;  %v505_v30 = vor.u32 %v602_v27, %v504_v25  ;;  %v509_v31 = vor.u32 %v600_v28, %v506_v29  ;;  %v597_v33 = vld [vmem:[#allocation3 + $0x2c] sm:$0xf0] }
  0x16   :  { %348 = vmatpush.bf16.msra.mxu2 %v537_v62  ;;  %v595_v34 = vld [vmem:[#allocation3 + $0x24] sm:$0xf]  ;;  %v481_v35 = vor.u32 %v597_v33, %v480_v32  ;;  %v482_v36 = vld [vmem:[#allocation3 + $0x30] sm:$0xf0]  ;;  %v488_v37 = vld [vmem:[#allocation3 + $0x28] sm:$0xf] }
  0x17   :  { %v598_v38 = vld [vmem:[#allocation3 + $0x34] sm:$0xf0]  ;;  %v485_v40 = vor.u32 %v595_v34, %v482_v36  ;;  %v596_v42 = vld [vmem:[#allocation3 + $0x2c] sm:$0xf]  ;;  %v490_v43 = vld [vmem:[#allocation3 + $0x38] sm:$0xf0] }
  0x18   :  { %v489_v41 = vor.u32 %v598_v38, %v488_v37  ;;  %v464_v44 = vld [vmem:[#allocation3] sm:$0xf]  ;;  %v493_v46 = vor.u32 %v596_v42, %v490_v43  ;;  %v593_v47 = vld [vmem:[#allocation3 + $0xc] sm:$0xf0]  ;;  %v591_v48 = vld [vmem:[#allocation3 + $0x4] sm:$0xf] }
  0x19   :  { %v466_v49 = vld [vmem:[#allocation3 + $0x10] sm:$0xf0]  ;;  %v465_v50 = vor.u32 %v593_v47, %v464_v44  ;;  %v472_v52 = vld [vmem:[#allocation3 + $0x8] sm:$0xf]  ;;  %v594_v53 = vld [vmem:[#allocation3 + $0x14] sm:$0xf0] }
  0x1a   :  { %v469_v51 = vor.u32 %v591_v48, %v466_v49  ;;  %v592_v54 = vld [vmem:[#allocation3 + $0xc] sm:$0xf]  ;;  %v473_v57 = vor.u32 %v594_v53, %v472_v52  ;;  %v474_v58 = vld [vmem:[#allocation3 + $0x18] sm:$0xf0] }
  0x7b   :  { %v45_v10 = vpop.xlane.xlu0 %44 }
  0x7c   :  { %v55_v11 = vmul.f32 %v726_v9, %v45_v10 }
  0x7e   :  { %v729_v12 = vsub.f32 %v625_v1, %v55_v11  ;;  %v541_v1 = vor.u32 %v608_v63, %v538_v0  ;;  %v517_v11 = vor.u32 %v603_v4, %v514_v6  ;;  %v636_v6 = vld [vmem:[%s783_s1] ss:$0 sm:$0xff] }
  0x80   :  { %v59_v13 = vmul.f32 %v729_v12, %v729_v12  ;;  %362 = vmatpush.bf16.msra.mxu3 %v541_v1  ;;  %335 = vmatpush.bf16.msra.mxu1 %v517_v11  ;;  %v637_v11 = vld [vmem:[%s784_s2] ss:$0 sm:$0xff] }
  0x82   :  { %61 = vadd.xlane.f32.xlu1 %v59_v13  ;;  %v521_v13 = vor.u32 %v606_v8, %v520_v7 }
  0x83   :  { %v47_v14 = vpop.xlane.xlu0 %46 }
  0x84   :  { %v56_v15 = vmul.f32 %v726_v9, %v47_v14  ;;  %v604_v14 = vld [vmem:[#allocation3 + $0x6c] sm:$0xf]  ;;  %349 = vmatpush.bf16.msra.mxu2 %v521_v13  ;;  %336 = vmatpush.bf16.msra.mxu1 %v501_v26 }
  0x86   :  { %v734_v16 = vsub.f32 %v626_v2, %v56_v15  ;;  %v512_v2 = vld [vmem:[#allocation3 + $0x60] sm:$0xf]  ;;  %v522_v15 = vld [vmem:[#allocation3 + $0x78] sm:$0xf0] }
  0x87   :  { %v513_v5 = vor.u32 %v605_v3, %v512_v2  ;;  %v525_v18 = vor.u32 %v604_v14, %v522_v15 }
  0x88   :  { %v60_v17 = vmul.f32 %v734_v16, %v734_v16  ;;  %350 = vmatpush.bf16.msra.mxu2 %v505_v30  ;;  %337 = vmatpush.bf16.msra.mxu1 %v485_v40 }
  0x89   :  { %321 = vmatpush.bf16.msra.mxu0 %v513_v5  ;;  %363 = vmatpush.bf16.msra.mxu3 %v525_v18 }
  0x8a   :  { %63 = vadd.xlane.f32.xlu1 %v60_v17 }
  0x8c   :  { %351 = vmatpush.bf16.msra.mxu2 %v489_v41  ;;  %338 = vmatpush.bf16.msra.mxu1 %v469_v51 }
  0x8d   :  { %322 = vmatpush.bf16.msra.mxu0 %v497_v23  ;;  %364 = vmatpush.bf16.msra.mxu3 %v509_v31 }
  0x90   :  { %352 = vmatpush.bf16.msra.mxu2 %v473_v57 }
  0x91   :  { %323 = vmatpush.bf16.msra.mxu0 %v481_v35  ;;  %365 = vmatpush.bf16.msra.mxu3 %v493_v46 }
  0x95   :  { %324 = vmatpush.bf16.msra.mxu0 %v465_v50 }
  0xf5   :  { %v62_v10 = vpop.xlane.xlu1 %61 }
  0xf6   :  { %v65_v17 = vmul.f32 %v62_v10, %v726_v9 }
  0xf8   :  { %v739_v22 = vadd.f32 1e-05, %v65_v17 }
  0xfa   :  { %640 = vrsqrt.f32 %v739_v22  ;;  %vm75_vm2 = vweird.f32 %v739_v22 }
  0xfd   :  { %v64_v39 = vpop.xlane.xlu1 %63 }
  0xfe   :  { %v66_v45 = vmul.f32 %v64_v39, %v726_v9  ;;  %v477_v9 = vor.u32 %v592_v54, %v474_v58 }
 0x100   :  { %v641_v55 = vpop.eup %640  ;;  %v68_v56 = vadd.f32 1e-05, %v66_v45  ;;  %366 = vmatpush.bf16.msra.mxu3 %v477_v9 }
 0x101   :  { %v70_v59 = vmul.f32 %v641_v55, %v739_v22  ;;  %vm76_vm1 = vweird.f32 %v641_v55 }
 0x102   :  { %642 = vrsqrt.f32 %v68_v56  ;;  %vm77_vm3 = vmor %vm75_vm2, %vm76_vm1  ;;  %vm85_vm5 = vweird.f32 %v68_v56 }
 0x103   :  { %v71_v60 = vmul.f32 %v641_v55, %v70_v59 }
 0x105   :  { %v72_v61 = vmul.f32 0.5, %v71_v60 }
 0x107   :  { %v73_v62 = vsub.f32 1.5, %v72_v61 }
 0x108   :  { %v643_v63 = vpop.eup %642 }
 0x109   :  { %v74_v0 = vmul.f32 %v641_v55, %v73_v62  ;;  %v80_v1 = vmul.f32 %v643_v63, %v68_v56  ;;  %vm86_vm4 = vweird.f32 %v643_v63 }
 0x10a   :  { %vm87_vm6 = vmor %vm85_vm5, %vm86_vm4 }
 0x10b   :  { %v81_v2 = vmul.f32 %v643_v63, %v80_v1  ;;  %v78_v3 = vsel %vm77_vm3, %v641_v55, %v74_v0 }
 0x10c   :  { %v89_v7 = vmul.f32 %v78_v3, %v729_v12  ;;  %v141_v12 = vld [vmem:[%s786_s4] sm:$0xf] }
 0x10d   :  { %v82_v4 = vmul.f32 0.5, %v81_v2  ;;  %v143_v21 = vperm.slane %v141_v12, 0  ;;  %v144_v22 = vperm.slane %v141_v12, 1  ;;  %v145_v28 = vperm.slane %v141_v12, 2 }
 0x10e   :  { %v95_v13 = vmul.f32 %v636_v6, %v89_v7  ;;  %v146_v29 = vperm.slane %v141_v12, 3 }
 0x10f   :  { %v83_v5 = vsub.f32 1.5, %v82_v4 }
 0x110   :  { %v101_v17 = vadd.f32 %v637_v11, %v95_v13 }
 0x111   :  { %v84_v8 = vmul.f32 %v643_v63, %v83_v5 }
 0x113   :  { %v88_v10 = vsel %vm87_vm6, %v643_v63, %v84_v8 }
 0x114   :  { %v90_v14 = vmul.f32 %v88_v10, %v734_v16 }
 0x116   :  { %v96_v15 = vmul.f32 %v636_v6, %v90_v14 }
 0x118   :  { %v102_v18 = vadd.f32 %v637_v11, %v96_v15 }
 0x11a   :  { %v630_v19 = vpack.c.bf16 %v102_v18, %v101_v17 }
 0x11c   :  { %631 = vst [vmem:[#allocation2] sm:$0xff] %v630_v19  }
 0x123   :  { %v590_v20 = vld [vmem:[#allocation2] sm:$0xff] }
 0x124   :  { %325 = vmatmul.bf16.vlgmr.msra.gmra.mxu0 %v590_v20  ;;  %339 = vmatmul.bf16.vlgmr.msra.gmra.mxu1 %v590_v20 }
 0x125   :  { %353 = vmatmul.bf16.vlgmr.msra.gmra.mxu2 %v590_v20  ;;  %367 = vmatmul.bf16.vlgmr.msra.gmra.mxu3 %v590_v20 }
 0x1a1   :  { %v326_v23 = vpop.f32.mrf.mxu0  ;;  %v340_v24 = vpop.f32.mrf.mxu1 }
 0x1a2   :  { %v327_v25 = vadd.f32 %v326_v23, %v143_v21  ;;  %v341_v16 = vadd.f32 %v340_v24, %v144_v22 }
 0x1a4   :  { %v381_v26 = vmul.f32 0.044715, %v327_v25  ;;  %v382_v27 = vmul.f32 0.044715, %v341_v16  ;;  %v373_v3 = vmul.f32 0.5, %v327_v25  ;;  %v374_v10 = vmul.f32 0.5, %v341_v16 }
 0x1a6   :  { %v389_v30 = vmul.f32 %v381_v26, %v327_v25  ;;  %v390_v31 = vmul.f32 %v382_v27, %v341_v16 }
 0x1a8   :  { %v397_v32 = vmul.f32 %v389_v30, %v327_v25  ;;  %v398_v33 = vmul.f32 %v390_v31, %v341_v16  ;;  %v354_v34 = vpop.f32.mrf.mxu2  ;;  %v368_v35 = vpop.f32.mrf.mxu3 }
 0x1a9   :  { %v355_v36 = vadd.f32 %v354_v34, %v145_v28  ;;  %v369_v37 = vadd.f32 %v368_v35, %v146_v29  ;;  %v328_v38 = vpop.f32.mrf.mxu0  ;;  %v342_v39 = vpop.f32.mrf.mxu1 }
 0x1aa   :  { %v405_v40 = vadd.f32 %v397_v32, %v327_v25  ;;  %v406_v41 = vadd.f32 %v398_v33, %v341_v16  ;;  %v756_v42 = vadd.f32 %v328_v38, %v143_v21  ;;  %v758_v43 = vadd.f32 %v342_v39, %v144_v22 }
 0x1ab   :  { %v383_v44 = vmul.f32 0.044715, %v355_v36  ;;  %v384_v45 = vmul.f32 0.044715, %v369_v37  ;;  %v375_v16 = vmul.f32 0.5, %v355_v36 }
 0x1ac   :  { %v413_v46 = vmul.f32 0.7978846, %v405_v40  ;;  %v414_v47 = vmul.f32 0.7978846, %v406_v41  ;;  %v385_v50 = vmul.f32 0.044715, %v756_v42 }
 0x1ad   :  { %v391_v48 = vmul.f32 %v383_v44, %v355_v36  ;;  %v392_v49 = vmul.f32 %v384_v45, %v369_v37  ;;  %v386_v51 = vmul.f32 0.044715, %v758_v43  ;;  %v377_v34 = vmul.f32 0.5, %v756_v42 }
 0x1ae   :  { %644 = vtanh.f32 %v413_v46  ;;  %v393_v54 = vmul.f32 %v385_v50, %v756_v42  ;;  %v378_v39 = vmul.f32 0.5, %v758_v43 }
 0x1af   :  { %646 = vtanh.f32 %v414_v47  ;;  %v399_v52 = vmul.f32 %v391_v48, %v355_v36  ;;  %v400_v53 = vmul.f32 %v392_v49, %v369_v37  ;;  %v394_v55 = vmul.f32 %v386_v51, %v758_v43 }
 0x1b0   :  { %v356_v56 = vpop.f32.mrf.mxu2  ;;  %v370_v57 = vpop.f32.mrf.mxu3  ;;  %v401_v9 = vmul.f32 %v393_v54, %v756_v42 }
 0x1b1   :  { %v407_v58 = vadd.f32 %v399_v52, %v355_v36  ;;  %v408_v59 = vadd.f32 %v400_v53, %v369_v37  ;;  %v357_v60 = vadd.f32 %v356_v56, %v145_v28  ;;  %v402_v61 = vmul.f32 %v394_v55, %v758_v43 }
 0x1b2   :  { %v371_v62 = vadd.f32 %v370_v57, %v146_v29  ;;  %v409_v1 = vadd.f32 %v401_v9, %v756_v42  ;;  %v376_v29 = vmul.f32 0.5, %v369_v37 }
 0x1b3   :  { %v415_v63 = vmul.f32 0.7978846, %v407_v58  ;;  %v416_v0 = vmul.f32 0.7978846, %v408_v59  ;;  %v410_v4 = vadd.f32 %v402_v61, %v758_v43  ;;  %v387_v5 = vmul.f32 0.044715, %v357_v60 }
 0x1b4   :  { %v645_v2 = vpop.eup %644  ;;  %v388_v6 = vmul.f32 0.044715, %v371_v62  ;;  %v417_v11 = vmul.f32 0.7978846, %v409_v1  ;;  %v379_v42 = vmul.f32 0.5, %v357_v60  ;;  %v380_v48 = vmul.f32 0.5, %v371_v62 }
 0x1b5   :  { %v647_v7 = vpop.eup %646  ;;  %v429_v8 = vadd.f32 1.0, %v645_v2  ;;  %648 = vtanh.f32 %v415_v63  ;;  %v418_v14 = vmul.f32 0.7978846, %v410_v4  ;;  %v395_v15 = vmul.f32 %v387_v5, %v357_v60 }
 0x1b6   :  { %v430_v13 = vadd.f32 1.0, %v647_v7  ;;  %650 = vtanh.f32 %v416_v0  ;;  %v396_v18 = vmul.f32 %v388_v6, %v371_v62 }
 0x1b7   :  { %v437_v17 = vmul.f32 %v429_v8, %v373_v3  ;;  %652 = vtanh.f32 %v417_v11  ;;  %v403_v20 = vmul.f32 %v395_v15, %v357_v60 }
 0x1b8   :  { %v438_v19 = vmul.f32 %v430_v13, %v374_v10  ;;  %654 = vtanh.f32 %v418_v14  ;;  %v404_v12 = vmul.f32 %v396_v18, %v371_v62 }
 0x1b9   :  { %v411_v22 = vadd.f32 %v403_v20, %v357_v60 }
 0x1ba   :  { %v445_v21 = vpack.c.bf16 %v438_v19, %v437_v17  ;;  %v412_v24 = vadd.f32 %v404_v12, %v371_v62 }
 0x1bb   :  { %v649_v23 = vpop.eup %648  ;;  %v419_v27 = vmul.f32 0.7978846, %v411_v22 }
 0x1bc   :  { %v651_v25 = vpop.eup %650  ;;  %449 = vst [vmem:[%s787_s5] sm:$0xff] %v445_v21  ;;  %v431_v26 = vadd.f32 1.0, %v649_v23  ;;  %v420_v31 = vmul.f32 0.7978846, %v412_v24 }
 0x1bd   :  { %v653_v28 = vpop.eup %652  ;;  %v432_v30 = vadd.f32 1.0, %v651_v25  ;;  %656 = vtanh.f32 %v419_v27 }
 0x1be   :  { %v655_v32 = vpop.eup %654  ;;  %v439_v33 = vmul.f32 %v431_v26, %v375_v16  ;;  %v433_v35 = vadd.f32 1.0, %v653_v28  ;;  %658 = vtanh.f32 %v420_v31 }
 0x1bf   :  { %v440_v38 = vmul.f32 %v432_v30, %v376_v29  ;;  %v434_v40 = vadd.f32 1.0, %v655_v32 }
 0x1c0   :  { %v441_v41 = vmul.f32 %v433_v35, %v377_v34 }
 0x1c1   :  { %v446_v44 = vpack.c.bf16 %v440_v38, %v439_v33  ;;  %v442_v36 = vmul.f32 %v434_v40, %v378_v39 }
 0x1c3   :  { %450 = vst [vmem:[%s787_s5 + $0x8] sm:$0xff] %v446_v44  ;;  %v447_v37 = vpack.c.bf16 %v442_v36, %v441_v41  ;;  %v657_v45 = vpop.eup %656 }
 0x1c4   :  { %v659_v46 = vpop.eup %658  ;;  %v435_v47 = vadd.f32 1.0, %v657_v45 }
 0x1c5   :  { %451 = vst [vmem:[%s787_s5 + $0x10] sm:$0xff] %v447_v37  ;;  %v436_v43 = vadd.f32 1.0, %v659_v46 }
 0x1c6   :  { %v443_v49 = vmul.f32 %v435_v47, %v379_v42 }
 0x1c7   :  { %v444_v50 = vmul.f32 %v436_v43, %v380_v48 }
 0x1c9   :  { %v448_v51 = vpack.c.bf16 %v444_v50, %v443_v49 }
 0x1cb   :  { %452 = vst [vmem:[%s787_s5 + $0x18] sm:$0xff] %v448_v51 }
 0x1cc   :  { %457 = vsyncpa [#allocation4], 1 }

// kernel: forward.22
= control target key start
LH: loop header
LB: loop body
LE: loop exit
PB: predicated region body
PF: predicated region fallthrough
CT: control target
= control target key end

     0   :  { %v150_v3 = vmov 128.0   ;;  %v151_v51 = vmov 0   ;;  %s211_s0 = inlined_call_operand.vmem [shape: bf16[16,128], index: 0, kind: input, shape index: {}]   ;;  %s212_s1 = inlined_call_operand.vmem [shape: f32[1,128], index: 1, kind: input, shape index: {}]   ;;  %s213_s2 = inlined_call_operand.vmem [shape: f32[1,128], index: 2, kind: input, shape index: {}]   ;;  %s214_s3 = inlined_call_operand.vmem [shape: f32[1,128], index: 3, kind: input, shape index: {}]   ;;  %s215_s4 = inlined_call_operand.<no memory space> [shape: f32[1,1], index: 4, kind: input, shape index: {}]   ;;  %s216_s5 = inlined_call_operand.vmem [shape: bf16[16,128], index: 5, kind: output, shape index: {0}]   ;;  %s217_s6 = inlined_call_operand.vmem [shape: f32[16,128], index: 6, kind: output, shape index: {1}]  }
   0x1   :  { %v128_v0 = vld [vmem:[%s211_s0] sm:$0xff]   ;;  %144 = vrcp.f32 %v150_v3  ;;  %v12_v21 = vstv %s215_s4  ;;  %138 = vset.pattern.permute.xlu0 %v151_v51  ;;  %139 = vset.pattern.permute.xlu1 %v151_v51 }
   0x2   :  { %v129_v1 = vunpack.c.l.bf16 %v128_v0  ;;  %v130_v2 = vunpack.c.h.bf16 %v128_v0  ;;  %13 = vst [vmem:[#allocation2] sm:$0x1] %v12_v21  ;;  %v140_v33 = vld [vmem:[%s212_s1] ss:$0 sm:$0xff] }
   0x3   :  { %v141_v37 = vld [vmem:[%s213_s2] ss:$0 sm:$0xff] }
   0x4   :  { %28 = vadd.xlane.f32.xlu0 %v129_v1  ;;  %v142_v40 = vld [vmem:[%s214_s3] ss:$0 sm:$0xff] }
   0x7   :  { %v145_v4 = vpop.eup %144 }
   0x8   :  { %v33_v5 = vmul.f32 128.0, %v145_v4  ;;  %vm37_vm0 = vweird.f32 %v145_v4 }
   0x9   :  { %v143_v52 = vld [vmem:[#allocation2] ss:$0 sm:$0xff] }
   0xa   :  { %v34_v6 = vsub.f32 1.0, %v33_v5 }
   0xc   :  { %30 = vadd.xlane.f32.xlu0 %v130_v2  ;;  %v35_v7 = vmul.f32 %v145_v4, %v34_v6 }
   0xe   :  { %v36_v8 = vadd.f32 %v145_v4, %v35_v7 }
  0x10   :  { %v38_v9 = vsel %vm37_vm0, %v145_v4, %v36_v8 }
  0x77   :  { %v29_v10 = vpop.xlane.xlu0 %28 }
  0x78   :  { %v39_v11 = vmul.f32 %v38_v9, %v29_v10 }
  0x7a   :  { %v41_v12 = vsub.f32 %v129_v1, %v39_v11 }
  0x7c   :  { %v43_v13 = vmul.f32 %v41_v12, %v41_v12 }
  0x7e   :  { %45 = vadd.xlane.f32.xlu1 %v43_v13 }
  0x7f   :  { %v31_v14 = vpop.xlane.xlu0 %30 }
  0x80   :  { %v40_v15 = vmul.f32 %v38_v9, %v31_v14 }
  0x82   :  { %v42_v16 = vsub.f32 %v130_v2, %v40_v15 }
  0x84   :  { %v44_v17 = vmul.f32 %v42_v16, %v42_v16 }
  0x86   :  { %47 = vadd.xlane.f32.xlu1 %v44_v17 }
  0xf1   :  { %v46_v18 = vpop.xlane.xlu1 %45 }
  0xf2   :  { %v49_v19 = vmul.f32 %v46_v18, %v38_v9 }
  0xf4   :  { %v51_v20 = vadd.f32 1e-05, %v49_v19 }
  0xf6   :  { %146 = vrsqrt.f32 %v51_v20  ;;  %vm59_vm2 = vweird.f32 %v51_v20 }
  0xf9   :  { %v48_v22 = vpop.xlane.xlu1 %47 }
  0xfa   :  { %v50_v23 = vmul.f32 %v48_v22, %v38_v9 }
  0xfc   :  { %v147_v24 = vpop.eup %146  ;;  %v52_v25 = vadd.f32 1e-05, %v50_v23 }
  0xfd   :  { %v54_v26 = vmul.f32 %v147_v24, %v51_v20  ;;  %vm60_vm1 = vweird.f32 %v147_v24 }
  0xfe   :  { %148 = vrsqrt.f32 %v52_v25  ;;  %vm61_vm3 = vmor %vm59_vm2, %vm60_vm1  ;;  %vm69_vm5 = vweird.f32 %v52_v25 }
  0xff   :  { %v55_v27 = vmul.f32 %v147_v24, %v54_v26 }
 0x101   :  { %v56_v28 = vmul.f32 0.5, %v55_v27 }
 0x103   :  { %v57_v29 = vsub.f32 1.5, %v56_v28 }
 0x104   :  { %v149_v30 = vpop.eup %148 }
 0x105   :  { %v58_v31 = vmul.f32 %v147_v24, %v57_v29  ;;  %v64_v32 = vmul.f32 %v149_v30, %v52_v25  ;;  %vm70_vm4 = vweird.f32 %v149_v30 }
 0x106   :  { %vm71_vm6 = vmor %vm69_vm5, %vm70_vm4 }
 0x107   :  { %v65_v34 = vmul.f32 %v149_v30, %v64_v32  ;;  %v62_v35 = vsel %vm61_vm3, %v147_v24, %v58_v31 }
 0x108   :  { %v73_v36 = vmul.f32 %v62_v35, %v41_v12 }
 0x109   :  { %v66_v38 = vmul.f32 0.5, %v65_v34 }
 0x10a   :  { %v79_v39 = vmul.f32 %v140_v33, %v73_v36 }
 0x10b   :  { %v67_v41 = vsub.f32 1.5, %v66_v38 }
 0x10c   :  { %v85_v42 = vadd.f32 %v141_v37, %v79_v39 }
 0x10d   :  { %v68_v43 = vmul.f32 %v149_v30, %v67_v41 }
 0x10e   :  { %v95_v44 = vmul.f32 %v142_v40, %v85_v42 }
 0x10f   :  { %v72_v45 = vsel %vm71_vm6, %v149_v30, %v68_v43 }
 0x110   :  { %97 = vadd.xlane.f32.xlu2 %v95_v44  ;;  %v74_v46 = vmul.f32 %v72_v45, %v42_v16 }
 0x112   :  { %v80_v47 = vmul.f32 %v140_v33, %v74_v46 }
 0x114   :  { %v86_v48 = vadd.f32 %v141_v37, %v80_v47 }
 0x116   :  { %v96_v49 = vmul.f32 %v142_v40, %v86_v48  ;;  %v134_v50 = vpack.c.bf16 %v86_v48, %v85_v42 }
 0x118   :  { %99 = vadd.xlane.f32.xlu2 %v96_v49  ;;  %135 = vst [vmem:[%s216_s5] sm:$0xff] %v134_v50  }
 0x183   :  { %v98_v53 = vpop.xlane.xlu2 %97 }
 0x184   :  { %v105_v54 = vadd.f32 %v143_v52, %v98_v53 }
 0x186   :  { %109 = vperm.xlu0 %138, %v105_v54  }
 0x18b   :  { %v100_v55 = vpop.xlane.xlu2 %99 }
 0x18c   :  { %v106_v56 = vadd.f32 %v143_v52, %v100_v55 }
 0x18e   :  { %114 = vperm.xlu1 %139, %v106_v56  }
 0x1f8   :  { %v110_v57 = vpop.permute.xlu0 %109 }
 0x1f9   :  { %117 = vst [vmem:[%s217_s6] sm:$0xff] %v110_v57 }
 0x200   :  { %v115_v58 = vpop.permute.xlu1 %114 }
 0x201   :  { %118 = vst [vmem:[%s217_s6 + $0x8] sm:$0xff] %v115_v58 }

// kernel: forward.23
= control target key start
LH: loop header
LB: loop body
LE: loop exit
PB: predicated region body
PF: predicated region fallthrough
CT: control target
= control target key end

     0   :  { %s379_s1 = inlined_call_operand.vmem [shape: bf16[128,256], index: 1, kind: input, shape index: {}]   ;;  %s380_s0 = inlined_call_operand.vmem [shape: bf16[16,128], index: 0, kind: input, shape index: {}]   ;;  %s381_s2 = inlined_call_operand.vmem [shape: f32[1,256], index: 2, kind: input, shape index: {}]   ;;  %s382_s3 = inlined_call_operand.vmem [shape: f32[16,256], index: 3, kind: output, shape index: {}]  }
   0x1   :  { %v222_v0 = vld [vmem:[%s379_s1 + $0x70] sm:$0xf]  ;;  %v244_v1 = vld [vmem:[%s379_s1 + $0x74] sm:$0xf0]  ;;  %v243_v2 = vld [vmem:[%s379_s1 + $0x74] sm:$0xf] }
   0x2   :  { %v223_v3 = vor.u32 %v244_v1, %v222_v0  ;;  %v224_v4 = vld [vmem:[%s379_s1 + $0x78] sm:$0xf0]  ;;  %v214_v5 = vld [vmem:[%s379_s1 + $0x60] sm:$0xf]  ;;  %v242_v6 = vld [vmem:[%s379_s1 + $0x64] sm:$0xf0] }
   0x3   :  { %v227_v7 = vor.u32 %v243_v2, %v224_v4  ;;  %v241_v8 = vld [vmem:[%s379_s1 + $0x64] sm:$0xf]  ;;  %v216_v9 = vld [vmem:[%s379_s1 + $0x68] sm:$0xf0]  ;;  %v215_v10 = vor.u32 %v242_v6, %v214_v5  ;;  %v206_v12 = vld [vmem:[%s379_s1 + $0x50] sm:$0xf] }
   0x4   :  { %124 = vmatpush.bf16.msra.mxu0 %v223_v3  ;;  %v219_v11 = vor.u32 %v241_v8, %v216_v9  ;;  %v240_v13 = vld [vmem:[%s379_s1 + $0x54] sm:$0xf0]  ;;  %v239_v14 = vld [vmem:[%s379_s1 + $0x54] sm:$0xf]  ;;  %v208_v15 = vld [vmem:[%s379_s1 + $0x58] sm:$0xf0] }
   0x5   :  { %138 = vmatpush.bf16.msra.mxu1 %v227_v7  ;;  %v207_v16 = vor.u32 %v240_v13, %v206_v12  ;;  %v211_v17 = vor.u32 %v239_v14, %v208_v15  ;;  %v198_v18 = vld [vmem:[%s379_s1 + $0x40] sm:$0xf]  ;;  %v238_v19 = vld [vmem:[%s379_s1 + $0x44] sm:$0xf0]  ;;  %v237_v20 = vld [vmem:[%s379_s1 + $0x44] sm:$0xf] }
   0x6   :  { %v200_v21 = vld [vmem:[%s379_s1 + $0x48] sm:$0xf0]  ;;  %v199_v22 = vor.u32 %v238_v19, %v198_v18  ;;  %v190_v24 = vld [vmem:[%s379_s1 + $0x30] sm:$0xf]  ;;  %v236_v25 = vld [vmem:[%s379_s1 + $0x34] sm:$0xf0] }
   0x7   :  { %v203_v23 = vor.u32 %v237_v20, %v200_v21  ;;  %v235_v26 = vld [vmem:[%s379_s1 + $0x34] sm:$0xf]  ;;  %v192_v27 = vld [vmem:[%s379_s1 + $0x38] sm:$0xf0]  ;;  %v191_v28 = vor.u32 %v236_v25, %v190_v24  ;;  %v182_v30 = vld [vmem:[%s379_s1 + $0x20] sm:$0xf] }
   0x8   :  { %125 = vmatpush.bf16.msra.mxu0 %v215_v10  ;;  %v195_v29 = vor.u32 %v235_v26, %v192_v27  ;;  %v234_v31 = vld [vmem:[%s379_s1 + $0x24] sm:$0xf0]  ;;  %v233_v32 = vld [vmem:[%s379_s1 + $0x24] sm:$0xf]  ;;  %v184_v33 = vld [vmem:[%s379_s1 + $0x28] sm:$0xf0] }
   0x9   :  { %139 = vmatpush.bf16.msra.mxu1 %v219_v11  ;;  %v183_v34 = vor.u32 %v234_v31, %v182_v30  ;;  %v187_v35 = vor.u32 %v233_v32, %v184_v33  ;;  %v174_v36 = vld [vmem:[%s379_s1 + $0x10] sm:$0xf]  ;;  %v232_v37 = vld [vmem:[%s379_s1 + $0x14] sm:$0xf0]  ;;  %v231_v38 = vld [vmem:[%s379_s1 + $0x14] sm:$0xf] }
   0xa   :  { %v176_v39 = vld [vmem:[%s379_s1 + $0x18] sm:$0xf0]  ;;  %v175_v40 = vor.u32 %v232_v37, %v174_v36  ;;  %v166_v42 = vld [vmem:[%s379_s1] sm:$0xf]  ;;  %v230_v43 = vld [vmem:[%s379_s1 + $0x4] sm:$0xf0] }
   0xb   :  { %v179_v41 = vor.u32 %v231_v38, %v176_v39  ;;  %v229_v44 = vld [vmem:[%s379_s1 + $0x4] sm:$0xf]  ;;  %v168_v45 = vld [vmem:[%s379_s1 + $0x8] sm:$0xf0]  ;;  %v167_v46 = vor.u32 %v230_v43, %v166_v42  ;;  %v32_v49 = vld [vmem:[%s381_s2] sm:$0x3] }
   0xc   :  { %126 = vmatpush.bf16.msra.mxu0 %v207_v16  ;;  %v171_v47 = vor.u32 %v229_v44, %v168_v45  ;;  %v228_v48 = vld [vmem:[%s380_s0] sm:$0xff]  ;;  %v34_v50 = vperm.slane %v32_v49, 0  ;;  %v35_v51 = vperm.slane %v32_v49, 1 }
   0xd   :  { %140 = vmatpush.bf16.msra.mxu1 %v211_v17 }
  0x10   :  { %127 = vmatpush.bf16.msra.mxu0 %v199_v22 }
  0x11   :  { %141 = vmatpush.bf16.msra.mxu1 %v203_v23 }
  0x14   :  { %128 = vmatpush.bf16.msra.mxu0 %v191_v28 }
  0x15   :  { %142 = vmatpush.bf16.msra.mxu1 %v195_v29 }
  0x18   :  { %129 = vmatpush.bf16.msra.mxu0 %v183_v34 }
  0x19   :  { %143 = vmatpush.bf16.msra.mxu1 %v187_v35 }
  0x1c   :  { %130 = vmatpush.bf16.msra.mxu0 %v175_v40 }
  0x1d   :  { %144 = vmatpush.bf16.msra.mxu1 %v179_v41 }
  0x20   :  { %131 = vmatpush.bf16.msra.mxu0 %v167_v46 }
  0x21   :  { %145 = vmatpush.bf16.msra.mxu1 %v171_v47 }
  0x23   :  { %132 = vmatmul.bf16.vlgmr.msra.gmra.mxu0 %v228_v48 }
  0x24   :  { %146 = vmatmul.bf16.vlgmr.msra.gmra.mxu1 %v228_v48 }
  0xa0   :  { %v133_v52 = vpop.f32.mrf.mxu0 }
  0xa1   :  { %v134_v53 = vadd.f32 %v133_v52, %v34_v50  ;;  %v147_v54 = vpop.f32.mrf.mxu1 }
  0xa2   :  { %v148_v55 = vadd.f32 %v147_v54, %v35_v51 }
  0xa3   :  { %152 = vst [vmem:[%s382_s3] sm:$0xff] %v134_v53 }
  0xa4   :  { %153 = vst [vmem:[%s382_s3 + $0x8] sm:$0xff] %v148_v55 }
  0xa8   :  { %v135_v56 = vpop.f32.mrf.mxu0 }
  0xa9   :  { %v136_v57 = vadd.f32 %v135_v56, %v34_v50  ;;  %v149_v58 = vpop.f32.mrf.mxu1 }
  0xaa   :  { %v150_v59 = vadd.f32 %v149_v58, %v35_v51 }
  0xab   :  { %154 = vst [vmem:[%s382_s3 + $0x10] sm:$0xff] %v136_v57 }
  0xac   :  { %155 = vst [vmem:[%s382_s3 + $0x18] sm:$0xff] %v150_v59 }

// kernel: forward.16
= control target key start
LH: loop header
LB: loop body
LE: loop exit
PB: predicated region body
PF: predicated region fallthrough
CT: control target
= control target key end

     0   :  { %9 = vsyncpa [#allocation3], 0  ;;  %s607_s18 = smov [#allocation2]   ;;  %s608_s20 = smov 64   ;;  %s671_s0 = inlined_call_operand.vmem [shape: bf16[16,512], index: 0, kind: input, shape index: {}]   ;;  %s672_s1 = inlined_call_operand.hbm [shape: bf16[512,128], index: 1, kind: input, shape index: {}]   ;;  %s673_s2 = inlined_call_operand.vmem [shape: f32[1,128], index: 2, kind: input, shape index: {}]   ;;  %s674_s3 = inlined_call_operand.vmem [shape: bf16[16,128], index: 3, kind: input, shape index: {}]   ;;  %s675_s4 = inlined_call_operand.vmem [shape: bf16[16,128], index: 4, kind: output, shape index: {}]  }
   0x1   :  { %s16_s17 = sshll.u32 %s672_s1, 4  ;;  %s18_s19 = sshll.u32 %s607_s18, 4  ;;  %s17_s17 = int_to_ptr.hbm [resolvable:$true] %s16_s17  ;;  %s19_s19 = int_to_ptr.vmem [resolvable:$true] %s18_s19 }
   0x2   :  { %s609_s21 = smov 4  }
   0x3   :  { %24 = dma.hbm_to_vmem [thread:$0]  %s17_s17, 4096, %s19_s19, [#allocation3], %s608_s20, %s608_s20, %s609_s21  }
   0x4   :  { %605 = dma.done.wait [#allocation3], 4096  }
   0x5   :  { %606 = vsyncadd [#allocation3], 4294963200  ;;  %v543_v0 = vld [vmem:[#allocation2 + $0x38] sm:$0xff]  ;;  %v542_v4 = vld [vmem:[#allocation2 + $0x30] sm:$0xff] }
   0x6   :  { %v551_v1 = vld [vmem:[#allocation2 + $0x78] sm:$0xff]  ;;  %317 = vmatpush.bf16.msra.mxu0 %v543_v0  ;;  %v550_v5 = vld [vmem:[#allocation2 + $0x70] sm:$0xff]  ;;  %v541_v8 = vld [vmem:[#allocation2 + $0x28] sm:$0xff] }
   0x7   :  { %v559_v2 = vld [vmem:[#allocation2 + $0xb8] sm:$0xff]  ;;  %331 = vmatpush.bf16.msra.mxu1 %v551_v1  ;;  %v558_v6 = vld [vmem:[#allocation2 + $0xb0] sm:$0xff]  ;;  %v549_v9 = vld [vmem:[#allocation2 + $0x68] sm:$0xff] }
   0x8   :  { %v567_v3 = vld [vmem:[#allocation2 + $0xf8] sm:$0xff]  ;;  %345 = vmatpush.bf16.msra.mxu2 %v559_v2  ;;  %v566_v7 = vld [vmem:[#allocation2 + $0xf0] sm:$0xff]  ;;  %v557_v10 = vld [vmem:[#allocation2 + $0xa8] sm:$0xff] }
   0x9   :  { %359 = vmatpush.bf16.msra.mxu3 %v567_v3  ;;  %v565_v11 = vld [vmem:[#allocation2 + $0xe8] sm:$0xff]  ;;  %v540_v12 = vld [vmem:[#allocation2 + $0x20] sm:$0xff]  ;;  %v539_v16 = vld [vmem:[#allocation2 + $0x18] sm:$0xff] }
   0xa   :  { %318 = vmatpush.bf16.msra.mxu0 %v542_v4  ;;  %v548_v13 = vld [vmem:[#allocation2 + $0x60] sm:$0xff]  ;;  %v547_v17 = vld [vmem:[#allocation2 + $0x58] sm:$0xff]  ;;  %v538_v20 = vld [vmem:[#allocation2 + $0x10] sm:$0xff] }
   0xb   :  { %332 = vmatpush.bf16.msra.mxu1 %v550_v5  ;;  %v556_v14 = vld [vmem:[#allocation2 + $0xa0] sm:$0xff]  ;;  %v555_v18 = vld [vmem:[#allocation2 + $0x98] sm:$0xff]  ;;  %v546_v21 = vld [vmem:[#allocation2 + $0x50] sm:$0xff] }
   0xc   :  { %346 = vmatpush.bf16.msra.mxu2 %v558_v6  ;;  %v564_v15 = vld [vmem:[#allocation2 + $0xe0] sm:$0xff]  ;;  %v563_v19 = vld [vmem:[#allocation2 + $0xd8] sm:$0xff]  ;;  %v554_v22 = vld [vmem:[#allocation2 + $0x90] sm:$0xff] }
   0xd   :  { %360 = vmatpush.bf16.msra.mxu3 %v566_v7  ;;  %v562_v23 = vld [vmem:[#allocation2 + $0xd0] sm:$0xff]  ;;  %v537_v24 = vld [vmem:[#allocation2 + $0x8] sm:$0xff]  ;;  %v536_v28 = vld [vmem:[#allocation2] sm:$0xff] }
   0xe   :  { %319 = vmatpush.bf16.msra.mxu0 %v541_v8  ;;  %v545_v25 = vld [vmem:[#allocation2 + $0x48] sm:$0xff]  ;;  %v544_v29 = vld [vmem:[#allocation2 + $0x40] sm:$0xff]  ;;  %v534_v33 = vld [vmem:[%s671_s0 + $0xc] sm:$0xf0] }
   0xf   :  { %333 = vmatpush.bf16.msra.mxu1 %v549_v9  ;;  %v553_v26 = vld [vmem:[#allocation2 + $0x88] sm:$0xff]  ;;  %v552_v30 = vld [vmem:[#allocation2 + $0x80] sm:$0xff]  ;;  %v392_v35 = vld [vmem:[%s671_s0 + $0x10] sm:$0xf0] }
  0x10   :  { %347 = vmatpush.bf16.msra.mxu2 %v557_v10  ;;  %v561_v27 = vld [vmem:[#allocation2 + $0xc8] sm:$0xff]  ;;  %v560_v31 = vld [vmem:[#allocation2 + $0xc0] sm:$0xff]  ;;  %v535_v37 = vld [vmem:[%s671_s0 + $0x14] sm:$0xf0] }
  0x11   :  { %361 = vmatpush.bf16.msra.mxu3 %v565_v11  ;;  %v390_v32 = vld [vmem:[%s671_s0] sm:$0xf]  ;;  %v532_v34 = vld [vmem:[%s671_s0 + $0x4] sm:$0xf]  ;;  %v398_v36 = vld [vmem:[%s671_s0 + $0x8] sm:$0xf] }
  0x12   :  { %320 = vmatpush.bf16.msra.mxu0 %v540_v12  ;;  %v533_v38 = vld [vmem:[%s671_s0 + $0xc] sm:$0xf]  ;;  %v400_v39 = vld [vmem:[%s671_s0 + $0x18] sm:$0xf0]  ;;  %v391_v40 = vor.u32 %v534_v33, %v390_v32  ;;  %v395_v41 = vor.u32 %v532_v34, %v392_v35  ;;  %v399_v42 = vor.u32 %v535_v37, %v398_v36  ;;  %v580_v44 = vld [vmem:[%s673_s2] ss:$0 sm:$0xff] }
  0x13   :  { %334 = vmatpush.bf16.msra.mxu1 %v548_v13  ;;  %v403_v43 = vor.u32 %v533_v38, %v400_v39  ;;  %v569_v54 = vld [vmem:[%s674_s3] sm:$0xff]  }
  0x14   :  { %348 = vmatpush.bf16.msra.mxu2 %v556_v14  ;;  %v570_v59 = vunpack.c.l.bf16 %v569_v54  ;;  %v571_v61 = vunpack.c.h.bf16 %v569_v54 }
  0x15   :  { %362 = vmatpush.bf16.msra.mxu3 %v564_v15 }
  0x16   :  { %321 = vmatpush.bf16.msra.mxu0 %v539_v16 }
  0x17   :  { %335 = vmatpush.bf16.msra.mxu1 %v547_v17 }
  0x18   :  { %349 = vmatpush.bf16.msra.mxu2 %v555_v18 }
  0x19   :  { %363 = vmatpush.bf16.msra.mxu3 %v563_v19 }
  0x1a   :  { %322 = vmatpush.bf16.msra.mxu0 %v538_v20 }
  0x1b   :  { %336 = vmatpush.bf16.msra.mxu1 %v546_v21 }
  0x1c   :  { %350 = vmatpush.bf16.msra.mxu2 %v554_v22 }
  0x1d   :  { %364 = vmatpush.bf16.msra.mxu3 %v562_v23 }
  0x1e   :  { %323 = vmatpush.bf16.msra.mxu0 %v537_v24 }
  0x1f   :  { %337 = vmatpush.bf16.msra.mxu1 %v545_v25 }
  0x20   :  { %351 = vmatpush.bf16.msra.mxu2 %v553_v26 }
  0x21   :  { %365 = vmatpush.bf16.msra.mxu3 %v561_v27 }
  0x22   :  { %324 = vmatpush.bf16.msra.mxu0 %v536_v28 }
  0x23   :  { %338 = vmatpush.bf16.msra.mxu1 %v544_v29 }
  0x24   :  { %352 = vmatpush.bf16.msra.mxu2 %v552_v30 }
  0x25   :  { %366 = vmatpush.bf16.msra.mxu3 %v560_v31  ;;  %325 = vmatmul.bf16.vlgmr.msra.gmra.mxu0 %v391_v40 }
  0x26   :  { %339 = vmatmul.bf16.vlgmr.msra.gmra.mxu1 %v395_v41 }
  0x27   :  { %353 = vmatmul.bf16.vlgmr.msra.gmra.mxu2 %v399_v42 }
  0x28   :  { %367 = vmatmul.bf16.vlgmr.msra.gmra.mxu3 %v403_v43 }
  0xa2   :  { %v326_v45 = vpop.f32.mrf.mxu0 }
  0xa3   :  { %v340_v46 = vpop.f32.mrf.mxu1  ;;  %v327_v47 = vadd.f32 %v580_v44, %v326_v45 }
  0xa5   :  { %v341_v50 = vadd.f32 %v340_v46, %v327_v47 }
  0xaa   :  { %v354_v48 = vpop.f32.mrf.mxu2  ;;  %v328_v51 = vpop.f32.mrf.mxu0 }
  0xab   :  { %v368_v49 = vpop.f32.mrf.mxu3  ;;  %v329_v52 = vadd.f32 %v580_v44, %v328_v51  ;;  %v355_v53 = vadd.f32 %v354_v48, %v341_v50  ;;  %v342_v55 = vpop.f32.mrf.mxu1 }
  0xad   :  { %v343_v56 = vadd.f32 %v342_v55, %v329_v52  ;;  %v369_v58 = vadd.f32 %v368_v49, %v355_v53 }
  0xaf   :  { %v377_v0 = vadd.f32 %v570_v59, %v369_v58 }
  0xb2   :  { %v356_v57 = vpop.f32.mrf.mxu2 }
  0xb3   :  { %v357_v60 = vadd.f32 %v356_v57, %v343_v56  ;;  %v370_v62 = vpop.f32.mrf.mxu3 }
  0xb5   :  { %v371_v63 = vadd.f32 %v370_v62, %v357_v60 }
  0xb7   :  { %v378_v1 = vadd.f32 %v571_v61, %v371_v63 }
  0xb9   :  { %v575_v2 = vpack.c.bf16 %v378_v1, %v377_v0 }
  0xbb   :  { %576 = vst [vmem:[%s675_s4] sm:$0xff] %v575_v2  }
  0xbc   :  { %387 = vsyncpa [#allocation3], 1 }

</bundles_post_ra>
